<compile_context>
chip_gen: v7x
topology: tpu7x:2x2x1
jax: 0.10.0
libtpu: 0.0.40
codegen_flags: <defaults>
</compile_context>

<pallas_src>
import jax
import jax.numpy as jnp
from jax import lax
from jax.experimental import pallas as pl
from jax.experimental.pallas import tpu as pltpu


def _round_up(x, m):
    return ((x + m - 1) // m) * m


def _make_kernel(score_lane):
    """score_lane = F: the spare lane that carries the score / edge_e / rowsum."""

    def kernel(x_ref, r_ref, wcum_ref, a_ref, idxc_ref, srcrow_ref,
               out_ref, taug_ref):
        eb = pl.program_id(1)
        n_eb = pl.num_programs(1)
        N_pad, F_pad = x_ref.shape
        R_pad = r_ref.shape[0]
        NR = N_pad + R_pad
        E_t = idxc_ref.shape[0]
        cdt = taug_ref.dtype                       # bf16 compute dtype for MXU operands

        # ---- once per head (first edge block): build combined table + zero accumulator.
        @pl.when(eb == 0)
        def _per_head_init():
            out_ref[...] = jnp.zeros_like(out_ref)
            lane = lax.broadcasted_iota(jnp.int32, (1, F_pad), 1)
            score_slot = (lane == score_lane).astype(jnp.float32)          # (1, F_pad)

            h_i = x_ref[...] * wcum_ref[...]                               # (N_pad, F_pad)
            s_h = jnp.dot(h_i, a_ref[:, 0:1],
                          preferred_element_type=jnp.float32)              # (N_pad, 1)
            taug_ref[:N_pad, :] = (h_i + score_slot * s_h).astype(cdt)

            r = r_ref[...]                                                 # (R_pad, F_pad)
            s_r = jnp.dot(r, a_ref[:, 1:2],
                          preferred_element_type=jnp.float32)              # (R_pad, 1)
            # negated features so the fused gather yields h[A2] - r[A1]; +score in lane F.
            taug_ref[N_pad:, :] = (score_slot * s_r - r).astype(cdt)

        # ---- per edge tile: one-hots (single orientation each; padded edges -> zero rows).
        idx = idxc_ref[...]                        # (E_t, 8) int32: [A0, A1+N_pad, A2, pad..]
        rel_col = idx[:, 1:2]                      # (E_t, 1)  A[1]+N_pad (row in combined tbl)
        dst_col = idx[:, 2:3]                      # (E_t, 1)  A[2]       (row in combined tbl)
        src_row = srcrow_ref[...]                  # (1, E_t)  A[0]       (scatter / rowsum)

        iota_nr = lax.broadcasted_iota(jnp.int32, (E_t, NR), 1)
        gat = ((dst_col == iota_nr) | (rel_col == iota_nr)).astype(cdt)    # (E_t, NR)
        iota_ne = lax.broadcasted_iota(jnp.int32, (N_pad, E_t), 0)
        sct = (iota_ne == src_row).astype(cdt)                             # (N_pad, E_t)

        # ---- single fused gather: lanes [0,F) = h[A2]-r[A1]; lane F = s_h + s_r.
        g_all = jnp.dot(gat, taug_ref[...],
                        preferred_element_type=jnp.float32)                # (E_t, F_pad)

        g = g_all[:, score_lane:score_lane + 1]                            # (E_t, 1)
        edge_e = jnp.exp(-jnp.where(g >= 0, g, 0.2 * g))                   # LeakyReLU(0.2)

        # ---- scatter operand: lanes [0,F) = edge_e * diff; lane F = edge_e (-> rowsum).
        lane_e = lax.broadcasted_iota(jnp.int32, (E_t, F_pad), 1)
        payload = (edge_e * jnp.where(lane_e == score_lane, 1.0, g_all)).astype(cdt)

        out_ref[...] += jnp.dot(sct, payload, preferred_element_type=jnp.float32)

        # ---- last edge block: normalize (rowsum rides in lane F of the accumulator).
        @pl.when(eb == n_eb - 1)
        def _finalize():
            acc = out_ref[...]
            inv = pl.reciprocal(acc[:, score_lane:score_lane + 1], approx=True)
            out_ref[...] = acc * inv

    return kernel


def lp_layer_forward(h, inputr, A, w, a_src_dst, *, edge_tile=512,
                     compute_dtype=jnp.bfloat16):
    """Pallas implementation of LPlayer.forward (diag=True, Rmode='', bias=False, eval)."""
    h = jnp.asarray(h, jnp.float32)
    inputr = jnp.asarray(inputr, jnp.float32)
    w = jnp.asarray(w, jnp.float32)
    a_src_dst = jnp.asarray(a_src_dst, jnp.float32)

    n_head = a_src_dst.shape[0]
    N, F = h.shape
    R = inputr.shape[0]
    E = A.shape[1]

    F_pad = _round_up(F + 1, 128)          # +1 spare lane for the fused score / rowsum
    N_pad = _round_up(N, 128)              # lane axis of the scatter one-hot
    R_pad = _round_up(R, 128)
    NR = N_pad + R_pad                     # row count of the combined gather table
    E_t = _round_up(min(edge_tile, max(E, 1)), 128)
    E_pad = _round_up(E, E_t)
    n_eb = E_pad // E_t
    score_lane = F

    # -- parameter / layout plumbing (tiny) -----------------------------------------------
    # head i uses h * prod_{j<i} w[j]  -> cumulative products decouple the heads.
    w_flat = w.reshape(max(n_head - 1, 0), F)
    wcum = jnp.concatenate(
        [jnp.ones((1, F), jnp.float32), jnp.cumprod(w_flat, axis=0)], axis=0)[:n_head]
    wcum_p = jnp.zeros((n_head, 1, F_pad), jnp.float32).at[:, 0, :F].set(wcum)

    a_p = jnp.zeros((n_head, F_pad, 2), jnp.float32).at[:, :F, :].set(
        jnp.transpose(a_src_dst[..., 0], (0, 2, 1)))            # col0 = a_i0, col1 = a_i1

    x_p = jnp.zeros((N_pad, F_pad), jnp.float32).at[:N, :F].set(h)
    r_p = jnp.zeros((R_pad, F_pad), jnp.float32).at[:R, :F].set(inputr)

    # padded edges get out-of-range indices -> all-zero one-hot rows -> zero contribution.
    A = A.astype(jnp.int32)
    pad_e = E_pad - E
    src = jnp.pad(A[0], (0, pad_e), constant_values=N_pad)          # >= N_pad -> no match
    rel_off = jnp.pad(A[1] + N_pad, (0, pad_e), constant_values=NR)  # pre-offset into table
    dst = jnp.pad(A[2], (0, pad_e), constant_values=NR)             # >= NR    -> no match
    idx_col = (jnp.zeros((E_pad, 8), jnp.int32)
               .at[:, 0].set(src).at[:, 1].set(rel_off).at[:, 2].set(dst))  # column-major
    src_row = src[None, :]                                                  # (1, E_pad) row

    # -- VMEM budget (with headroom), clamped to stay portable across v5e/v6e/v7x ---------
    cb = jnp.dtype(compute_dtype).itemsize
    est = ((N_pad + R_pad) * F_pad * 4            # resident x / inputr blocks
           + 2 * N_pad * F_pad * 4                # output accumulator block
           + NR * F_pad * cb                      # combined-table scratch
           + 2 * (E_t * 8 + E_t) * 4              # edge-index blocks (dbl-buffered)
           + E_t * (NR + N_pad) * cb              # one-hot temporaries
           + 3 * E_t * F_pad * 4)                 # gathered / payload temporaries
    vmem_limit = int(min(max(2 * est + (4 << 20), 32 << 20), 56 << 20))

    out_full = pl.pallas_call(
        _make_kernel(score_lane),
        out_shape=jax.ShapeDtypeStruct((n_head, N_pad, F_pad), jnp.float32),
        grid_spec=pltpu.PrefetchScalarGridSpec(
            num_scalar_prefetch=0,
            grid=(n_head, n_eb),
            in_specs=[
                pl.BlockSpec((N_pad, F_pad), lambda i, e: (0, 0)),       # x (resident)
                pl.BlockSpec((R_pad, F_pad), lambda i, e: (0, 0)),       # inputr (resident)
                pl.BlockSpec((None, 1, F_pad), lambda i, e: (i, 0, 0)),  # cumulative w[i]
                pl.BlockSpec((None, F_pad, 2), lambda i, e: (i, 0, 0)),  # a_src_dst[i]
                pl.BlockSpec((E_t, 8), lambda i, e: (e, 0)),             # edge idx (cols)
                pl.BlockSpec((1, E_t), lambda i, e: (0, e)),             # A[0] row (lanes)
            ],
            out_specs=pl.BlockSpec((None, N_pad, F_pad), lambda i, e: (i, 0, 0)),
            scratch_shapes=[pltpu.VMEM((NR, F_pad), compute_dtype)],     # combined table
        ),
        compiler_params=pltpu.CompilerParams(
            dimension_semantics=("parallel", "arbitrary"),
            vmem_limit_bytes=vmem_limit),
    )(x_p, r_p, wcum_p, a_p, idx_col, src_row)

    return out_full[:, :N, :F]


def ref_forward(h, inputr, A, w, a_src_dst):
    """Pure-JAX replica of LPlayer.forward (diag=True, bias=False, eval mode)."""
    n_head = a_src_dst.shape[0]
    N, F = h.shape
    outs = []
    for i in range(n_head):
        if i >= 1:
            h = h * w[i - 1]
        e = (h[A[2]] @ a_src_dst[i, 0] + inputr[A[1]] @ a_src_dst[i, 1])[:, 0]
        edge_e = jnp.exp(-jnp.where(e >= 0, e, 0.2 * e))
        rowsum = jnp.zeros((N,), jnp.float32).at[A[0]].add(edge_e)
        diff = h[A[2]] - inputr[A[1]]
        h_prime = jnp.zeros((N, F), jnp.float32).at[A[0]].add(edge_e[:, None] * diff)
        outs.append(h_prime / rowsum[:, None])
    return jnp.stack(outs, axis=0)


if __name__ == "__main__":
    n_head, N, F, R = 2, 48, 32, 8          # f_in == f_out == F (diag=True)
    E_extra = 208                           # total E = 256 -> 2 edge blocks with edge_tile=128

    key = jax.random.PRNGKey(0)
    k = jax.random.split(key, 8)

    h = jax.random.normal(k[0], (N, F), jnp.float32)
    inputr = 0.5 * jax.random.normal(k[1], (R, F), jnp.float32)
    w = 1.0 + 0.3 * jax.random.normal(k[2], (n_head - 1, 1, F), jnp.float32)
    a_src_dst = 0.1 * jax.random.normal(k[3], (n_head, 2, F, 1), jnp.float32)

    # Graph: self-loops (every node appears in A[0] -> rowsum > 0) + random edges.
    src_extra = jax.random.randint(k[4], (E_extra,), 0, N)
    dst_extra = jax.random.randint(k[5], (E_extra,), 0, N)
    rel_all = jax.random.randint(k[6], (N + E_extra,), 0, R)
    A0 = jnp.concatenate([jnp.arange(N), src_extra]).astype(jnp.int32)   # scatter / rowsum
    A2 = jnp.concatenate([jnp.arange(N), dst_extra]).astype(jnp.int32)   # gather into h
    A1 = rel_all.astype(jnp.int32)                                       # gather into inputr
    A = jnp.stack([A0, A1, A2], axis=0)                                  # (3, E)

    out = jax.block_until_ready(
        lp_layer_forward(h, inputr, A, w, a_src_dst, edge_tile=128))
    ref = ref_forward(h, inputr, A, w, a_src_dst)

    assert out.shape == (n_head, N, F)
    if not bool(jnp.allclose(out, ref, atol=5e-2, rtol=5e-2)):
        raise AssertionError(
            f"kernel/ref mismatch, max abs err={float(jnp.max(jnp.abs(out - ref)))}")
    print("KERNEL_OK")
</pallas_src>

<mosaic_0001>
module attributes {stable_mosaic.version = 11 : i64} {
  func.func @kernel(%arg0: i32, %arg1: i32, %arg2: memref<128x128xf32, #tpu.memory_space<vmem>>, %arg3: memref<128x128xf32, #tpu.memory_space<vmem>>, %arg4: memref<1x1x128xf32, #tpu.memory_space<vmem>>, %arg5: memref<1x128x2xf32, #tpu.memory_space<vmem>>, %arg6: memref<128x8xi32, #tpu.memory_space<vmem>>, %arg7: memref<1x128xi32, #tpu.memory_space<vmem>>, %arg8: memref<1x128x128xf32, #tpu.memory_space<vmem>>, %arg9: memref<256x128xbf16, #tpu.memory_space<vmem>>) attributes {dimension_semantics = [#tpu.dimension_semantics<parallel>, #tpu.dimension_semantics<arbitrary>], iteration_bounds = array<i64: 2, 2>, scalar_prefetch = 0 : i64, scratch_operands = 1 : i64, tpu.core_type = #tpu.core_type<tc>, window_params = [{pipeline_mode = #tpu.pipeline_mode<synchronous>, transform_indices = @transform_0, window_bounds = array<i64: 128, 128>}, {pipeline_mode = #tpu.pipeline_mode<synchronous>, transform_indices = @transform_1, window_bounds = array<i64: 128, 128>}, {transform_indices = @transform_2, window_bounds = array<i64: 1, 1, 128>}, {transform_indices = @transform_3, window_bounds = array<i64: 1, 128, 2>}, {transform_indices = @transform_4, window_bounds = array<i64: 128, 8>}, {transform_indices = @transform_5, window_bounds = array<i64: 1, 128>}, {transform_indices = @transform_6, window_bounds = array<i64: 1, 128, 128>}]} {
    %c0_i32 = arith.constant 0 : i32
    %0 = arith.cmpi eq, %arg1, %c0_i32 : i32
    %1 = arith.extui %0 : i1 to i32
    %c0_i32_0 = arith.constant 0 : i32
    %2 = arith.cmpi ne, %1, %c0_i32_0 : i32
    scf.if %2 {
      %cst_18 = arith.constant 0.000000e+00 : f32
      %51 = vector.broadcast %cst_18 : f32 to vector<128x128xf32>
      %c0_19 = arith.constant 0 : index
      %c0_20 = arith.constant 0 : index
      %c0_21 = arith.constant 0 : index
      %52 = vector.load %arg8[%c0_19, %c0_20, %c0_21] : memref<1x128x128xf32, #tpu.memory_space<vmem>>, vector<1x128x128xf32>
      %53 = vector.shape_cast %52 : vector<1x128x128xf32> to vector<128x128xf32>
      %54 = vector.shape_cast %51 : vector<128x128xf32> to vector<1x128x128xf32>
      tpu.vector_store %arg8[%c0_19, %c0_20, %c0_21], %54 {strides = array<i32>} : memref<1x128x128xf32, #tpu.memory_space<vmem>>, vector<1x128x128xf32>,
      %55 = tpu.iota {dimensions = array<i32: 1>} : vector<1x128xi32>
      %c32_i32_22 = arith.constant 32 : i32
      %56 = vector.broadcast %c32_i32_22 : i32 to vector<1x128xi32>
      %57 = arith.cmpi eq, %55, %56 : vector<1x128xi32>
      %58 = arith.extui %57 : vector<1x128xi1> to vector<1x128xi32>
      %59 = arith.sitofp %58 : vector<1x128xi32> to vector<1x128xf32>
      %c0_23 = arith.constant 0 : index
      %c0_24 = arith.constant 0 : index
      %60 = vector.load %arg2[%c0_23, %c0_24] : memref<128x128xf32, #tpu.memory_space<vmem>>, vector<128x128xf32>
      %c0_25 = arith.constant 0 : index
      %c0_26 = arith.constant 0 : index
      %c0_27 = arith.constant 0 : index
      %61 = vector.load %arg4[%c0_25, %c0_26, %c0_27] : memref<1x1x128xf32, #tpu.memory_space<vmem>>, vector<1x1x128xf32>
      %62 = vector.shape_cast %61 : vector<1x1x128xf32> to vector<1x128xf32>
      %63 = vector.broadcast %62 : vector<1x128xf32> to vector<128x128xf32>
      %64 = arith.mulf %60, %63 : vector<128x128xf32>
      %c0_28 = arith.constant 0 : index
      %c0_29 = arith.constant 0 : index
      %c0_30 = arith.constant 0 : index
      %65 = vector.load %arg5[%c0_28, %c0_29, %c0_30] : memref<1x128x2xf32, #tpu.memory_space<vmem>>, vector<1x128x1xf32>
      %66 = vector.shape_cast %65 : vector<1x128x1xf32> to vector<128x1xf32>
      %cst_31 = arith.constant dense<0.000000e+00> : vector<128x1xf32>
      %67 = tpu.matmul %64, %66, %cst_31 {dimension_numbers = #tpu.dot_dimension_numbers<[1], [0], [0], [1], [0, 0, 1, 1], [], []>} : vector<128x128xf32>, vector<128x1xf32>, vector<128x1xf32> -> vector<128x1xf32>
      %68 = vector.broadcast %59 : vector<1x128xf32> to vector<128x128xf32>
      %69 = vector.broadcast %67 : vector<128x1xf32> to vector<128x128xf32>
      %70 = arith.mulf %68, %69 : vector<128x128xf32>
      %71 = arith.addf %64, %70 : vector<128x128xf32>
      %72 = arith.truncf %71 : vector<128x128xf32> to vector<128x128xbf16>
      %c0_32 = arith.constant 0 : index
      %c0_33 = arith.constant 0 : index
      %73 = vector.load %arg9[%c0_32, %c0_33] : memref<256x128xbf16, #tpu.memory_space<vmem>>, vector<128x128xbf16>
      tpu.vector_store %arg9[%c0_32, %c0_33], %72 {strides = array<i32>} : memref<256x128xbf16, #tpu.memory_space<vmem>>, vector<128x128xbf16>,
      %c0_34 = arith.constant 0 : index
      %c0_35 = arith.constant 0 : index
      %74 = vector.load %arg3[%c0_34, %c0_35] : memref<128x128xf32, #tpu.memory_space<vmem>>, vector<128x128xf32>
      %c0_36 = arith.constant 0 : index
      %c0_37 = arith.constant 0 : index
      %c1 = arith.constant 1 : index
      %75 = vector.load %arg5[%c0_36, %c0_37, %c1] : memref<1x128x2xf32, #tpu.memory_space<vmem>>, vector<1x128x1xf32>
      %76 = vector.shape_cast %75 : vector<1x128x1xf32> to vector<128x1xf32>
      %cst_38 = arith.constant dense<0.000000e+00> : vector<128x1xf32>
      %77 = tpu.matmul %74, %76, %cst_38 {dimension_numbers = #tpu.dot_dimension_numbers<[1], [0], [0], [1], [0, 0, 1, 1], [], []>} : vector<128x128xf32>, vector<128x1xf32>, vector<128x1xf32> -> vector<128x1xf32>
      %78 = vector.broadcast %59 : vector<1x128xf32> to vector<128x128xf32>
      %79 = vector.broadcast %77 : vector<128x1xf32> to vector<128x128xf32>
      %80 = arith.mulf %78, %79 : vector<128x128xf32>
      %81 = arith.subf %80, %74 : vector<128x128xf32>
      %82 = arith.truncf %81 : vector<128x128xf32> to vector<128x128xbf16>
      %c128 = arith.constant 128 : index
      %c0_39 = arith.constant 0 : index
      %83 = vector.load %arg9[%c128, %c0_39] : memref<256x128xbf16, #tpu.memory_space<vmem>>, vector<128x128xbf16>
      tpu.vector_store %arg9[%c128, %c0_39], %82 {strides = array<i32>} : memref<256x128xbf16, #tpu.memory_space<vmem>>, vector<128x128xbf16>,
    } else {
    }
    %c0 = arith.constant 0 : index
    %c0_1 = arith.constant 0 : index
    %3 = vector.load %arg6[%c0, %c0_1] : memref<128x8xi32, #tpu.memory_space<vmem>>, vector<128x8xi32>
    %4 = vector.extract_strided_slice %3 {offsets = [0, 1], sizes = [128, 1], strides = [1, 1]} : vector<128x8xi32> to vector<128x1xi32>
    %5 = vector.extract_strided_slice %3 {offsets = [0, 2], sizes = [128, 1], strides = [1, 1]} : vector<128x8xi32> to vector<128x1xi32>
    %c0_2 = arith.constant 0 : index
    %c0_3 = arith.constant 0 : index
    %6 = vector.load %arg7[%c0_2, %c0_3] : memref<1x128xi32, #tpu.memory_space<vmem>>, vector<1x128xi32>
    %7 = tpu.iota {dimensions = array<i32: 1>} : vector<128x256xi32>
    %8 = vector.broadcast %5 : vector<128x1xi32> to vector<128x256xi32>
    %9 = arith.cmpi eq, %8, %7 : vector<128x256xi32>
    %10 = vector.broadcast %4 : vector<128x1xi32> to vector<128x256xi32>
    %11 = arith.cmpi eq, %10, %7 : vector<128x256xi32>
    %12 = arith.ori %9, %11 : vector<128x256xi1>
    %13 = arith.extui %12 : vector<128x256xi1> to vector<128x256xi32>
    %14 = arith.sitofp %13 : vector<128x256xi32> to vector<128x256xf32>
    %15 = arith.truncf %14 : vector<128x256xf32> to vector<128x256xbf16>
    %16 = tpu.iota {dimensions = array<i32: 0>} : vector<128x128xi32>
    %17 = vector.broadcast %6 : vector<1x128xi32> to vector<128x128xi32>
    %18 = arith.cmpi eq, %16, %17 : vector<128x128xi32>
    %19 = arith.extui %18 : vector<128x128xi1> to vector<128x128xi32>
    %20 = arith.sitofp %19 : vector<128x128xi32> to vector<128x128xf32>
    %21 = arith.truncf %20 : vector<128x128xf32> to vector<128x128xbf16>
    %c0_4 = arith.constant 0 : index
    %c0_5 = arith.constant 0 : index
    %22 = vector.load %arg9[%c0_4, %c0_5] : memref<256x128xbf16, #tpu.memory_space<vmem>>, vector<256x128xbf16>
    %cst = arith.constant dense<0.000000e+00> : vector<128x128xf32>
    %23 = tpu.matmul %15, %22, %cst {dimension_numbers = #tpu.dot_dimension_numbers<[1], [0], [0], [1], [0, 0, 1, 1], [], []>} : vector<128x256xbf16>, vector<256x128xbf16>, vector<128x128xf32> -> vector<128x128xf32>
    %24 = vector.extract_strided_slice %23 {offsets = [0, 32], sizes = [128, 1], strides = [1, 1]} : vector<128x128xf32> to vector<128x1xf32>
    %cst_6 = arith.constant 0.000000e+00 : f32
    %25 = vector.broadcast %cst_6 : f32 to vector<128x1xf32>
    %26 = arith.cmpf oge, %24, %25 : vector<128x1xf32>
    %cst_7 = arith.constant 2.000000e-01 : f32
    %27 = vector.broadcast %cst_7 : f32 to vector<128x1xf32>
    %28 = arith.mulf %27, %24 : vector<128x1xf32>
    %29 = arith.select %26, %24, %28 : vector<128x1xi1>, vector<128x1xf32>
    %cst_8 = arith.constant 0.000000e+00 : f32
    %30 = vector.broadcast %cst_8 : f32 to vector<128x1xf32>
    %31 = arith.subf %30, %29 : vector<128x1xf32>
    %32 = math.exp %31 : vector<128x1xf32>
    %33 = tpu.iota {dimensions = array<i32: 1>} : vector<128x128xi32>
    %c32_i32 = arith.constant 32 : i32
    %34 = vector.broadcast %c32_i32 : i32 to vector<128x128xi32>
    %35 = arith.cmpi eq, %33, %34 : vector<128x128xi32>
    %cst_9 = arith.constant 1.000000e+00 : f32
    %36 = vector.broadcast %cst_9 : f32 to vector<128x128xf32>
    %37 = arith.select %35, %36, %23 : vector<128x128xi1>, vector<128x128xf32>
    %38 = vector.broadcast %32 : vector<128x1xf32> to vector<128x128xf32>
    %39 = arith.mulf %38, %37 : vector<128x128xf32>
    %40 = arith.truncf %39 : vector<128x128xf32> to vector<128x128xbf16>
    %c0_10 = arith.constant 0 : index
    %c0_11 = arith.constant 0 : index
    %c0_12 = arith.constant 0 : index
    %41 = vector.load %arg8[%c0_10, %c0_11, %c0_12] : memref<1x128x128xf32, #tpu.memory_space<vmem>>, vector<1x128x128xf32>
    %42 = vector.shape_cast %41 : vector<1x128x128xf32> to vector<128x128xf32>
    %cst_13 = arith.constant dense<0.000000e+00> : vector<128x128xf32>
    %43 = tpu.matmul %21, %40, %cst_13 {dimension_numbers = #tpu.dot_dimension_numbers<[1], [0], [0], [1], [0, 0, 1, 1], [], []>} : vector<128x128xbf16>, vector<128x128xbf16>, vector<128x128xf32> -> vector<128x128xf32>
    %44 = arith.addf %42, %43 : vector<128x128xf32>
    %c0_14 = arith.constant 0 : index
    %c0_15 = arith.constant 0 : index
    %c0_16 = arith.constant 0 : index
    %45 = vector.load %arg8[%c0_14, %c0_15, %c0_16] : memref<1x128x128xf32, #tpu.memory_space<vmem>>, vector<1x128x128xf32>
    %46 = vector.shape_cast %45 : vector<1x128x128xf32> to vector<128x128xf32>
    %47 = vector.shape_cast %44 : vector<128x128xf32> to vector<1x128x128xf32>
    tpu.vector_store %arg8[%c0_14, %c0_15, %c0_16], %47 {strides = array<i32>} : memref<1x128x128xf32, #tpu.memory_space<vmem>>, vector<1x128x128xf32>,
    %c1_i32 = arith.constant 1 : i32
    %48 = arith.cmpi eq, %arg1, %c1_i32 : i32
    %49 = arith.extui %48 : i1 to i32
    %c0_i32_17 = arith.constant 0 : i32
    %50 = arith.cmpi ne, %49, %c0_i32_17 : i32
    scf.if %50 {
      %c0_18 = arith.constant 0 : index
      %c0_19 = arith.constant 0 : index
      %c0_20 = arith.constant 0 : index
      %51 = vector.load %arg8[%c0_18, %c0_19, %c0_20] : memref<1x128x128xf32, #tpu.memory_space<vmem>>, vector<1x128x128xf32>
      %52 = vector.shape_cast %51 : vector<1x128x128xf32> to vector<128x128xf32>
      %53 = vector.extract_strided_slice %52 {offsets = [0, 32], sizes = [128, 1], strides = [1, 1]} : vector<128x128xf32> to vector<128x1xf32>
      %54 = tpu.reciprocal %53 {approx = true} : vector<128x1xf32> -> vector<128x1xf32>
      %55 = vector.broadcast %54 : vector<128x1xf32> to vector<128x128xf32>
      %56 = arith.mulf %52, %55 : vector<128x128xf32>
      %c0_21 = arith.constant 0 : index
      %c0_22 = arith.constant 0 : index
      %c0_23 = arith.constant 0 : index
      %57 = vector.load %arg8[%c0_21, %c0_22, %c0_23] : memref<1x128x128xf32, #tpu.memory_space<vmem>>, vector<1x128x128xf32>
      %58 = vector.shape_cast %57 : vector<1x128x128xf32> to vector<128x128xf32>
      %59 = vector.shape_cast %56 : vector<128x128xf32> to vector<1x128x128xf32>
      tpu.vector_store %arg8[%c0_21, %c0_22, %c0_23], %59 {strides = array<i32>} : memref<1x128x128xf32, #tpu.memory_space<vmem>>, vector<1x128x128xf32>,
    } else {
    }
    return
  }
  func.func @transform_0(%arg0: i32, %arg1: i32) -> (i32, i32) {
    %c0_i32 = arith.constant 0 : i32
    %c0_i32_0 = arith.constant 0 : i32
    %c0_i32_1 = arith.constant 0 : i32
    return %c0_i32, %c0_i32_0 : i32, i32
  }
  func.func @transform_1(%arg0: i32, %arg1: i32) -> (i32, i32) {
    %c0_i32 = arith.constant 0 : i32
    %c0_i32_0 = arith.constant 0 : i32
    %c0_i32_1 = arith.constant 0 : i32
    return %c0_i32, %c0_i32_0 : i32, i32
  }
  func.func @transform_2(%arg0: i32, %arg1: i32) -> (i32, i32, i32) {
    %c0_i32 = arith.constant 0 : i32
    %c0_i32_0 = arith.constant 0 : i32
    %c0_i32_1 = arith.constant 0 : i32
    return %arg0, %c0_i32, %c0_i32_0 : i32, i32, i32
  }
  func.func @transform_3(%arg0: i32, %arg1: i32) -> (i32, i32, i32) {
    %c0_i32 = arith.constant 0 : i32
    %c0_i32_0 = arith.constant 0 : i32
    %c0_i32_1 = arith.constant 0 : i32
    return %arg0, %c0_i32, %c0_i32_0 : i32, i32, i32
  }
  func.func @transform_4(%arg0: i32, %arg1: i32) -> (i32, i32) {
    %c0_i32 = arith.constant 0 : i32
    %c0_i32_0 = arith.constant 0 : i32
    return %arg1, %c0_i32 : i32, i32
  }
  func.func @transform_5(%arg0: i32, %arg1: i32) -> (i32, i32) {
    %c0_i32 = arith.constant 0 : i32
    %c0_i32_0 = arith.constant 0 : i32
    return %c0_i32, %arg1 : i32, i32
  }
  func.func @transform_6(%arg0: i32, %arg1: i32) -> (i32, i32, i32) {
    %c0_i32 = arith.constant 0 : i32
    %c0_i32_0 = arith.constant 0 : i32
    %c0_i32_1 = arith.constant 0 : i32
    return %arg0, %c0_i32, %c0_i32_0 : i32, i32, i32
  }
}

</mosaic_0001>

<bundles_post_ra>
// kernel: tpu_custom_call.1
= control target key start
LH: loop header
LB: loop body
LE: loop exit
PB: predicated region body
PF: predicated region fallthrough
CT: control target
= control target key end

     0   :  { %11 = vsyncpa [#allocation4], 0  ;;  %s3898_s0 = inlined_call_operand.vmem [shape: f32[128,128], index: 0, kind: input, shape index: {}]   ;;  %s3899_s1 = inlined_call_operand.vmem [shape: f32[128,128], index: 1, kind: input, shape index: {}]   ;;  %s3900_s2 = inlined_call_operand.vmem [shape: f32[2,1,128], index: 2, kind: input, shape index: {}]   ;;  %s3901_s3 = inlined_call_operand.vmem [shape: f32[2,128,2], index: 3, kind: input, shape index: {}]   ;;  %s3902_s4 = inlined_call_operand.vmem [shape: s32[256,8], index: 4, kind: input, shape index: {}]   ;;  %s3903_s5 = inlined_call_operand.vmem [shape: s32[1,256], index: 5, kind: input, shape index: {}]   ;;  %s3904_s6 = inlined_call_operand.hbm [shape: f32[2,128,128], index: 6, kind: output, shape index: {}]  }
   0x1   :  { %13 = vsyncpa [#allocation4 + $0x1], 0  ;;  %s2968_s21 = smov 0   ;;  %s2970_s22 = smov 0  }
   0x2   :  { %s2972_s23 = smov 0   ;;  %s2974_s24 = smov 0  }
   0x3   :  { %s2976_s25 = smov 0   ;;  %s2978_s26 = smov 0  }
   0x4   :  { %s2980_s27 = smov 0   ;;  %s2982_s28 = smov 0  }
   0x5 LB: > { %3910 = sst [smem:[#allocation6_spill]] %s2900_s23  ;;  %s2144_s29 = sadd.s32 4294967295, %s2920_s28   ;;  %s2920_s28 = sphi %s2982_s28, %s19_s28   ;;  %s2916_s27 = sphi %s2980_s27, %s3940_s27   ;;  %s2912_s26 = sphi %s2978_s26, %s3939_s26   ;;  %s2908_s25 = sphi %s2976_s25, %s3938_s25   ;;  %s2904_s24 = sphi %s2974_s24, %s3937_s24   ;;  %s2900_s23 = sphi %s2972_s23, %s3936_s23   ;;  %s2896_s22 = sphi %s2970_s22, %s3942_s22   ;;  %s2892_s21 = sphi %s2968_s21, %s3941_s21  }
   0x6   : > { %3911 = sst [smem:[#allocation7_spill]] %s2912_s26  ;;  %s2145_s30 = sadd.s32 4294967294, %s2920_s28  }
   0x7   : > { %3912 = sst [smem:[#allocation8_spill]] %s2916_s27  ;;  %s28_s7 = sadd.s32 1, %s2912_s26 }
   0x8   : > { %p29_p0 = scmp.ge.s32.totalorder %s28_s7, 2  ;;  %s31_s8 = sadd.s32 1, %s2916_s27 }
   0x9   : > { %p194_p1 = scmp.ne.s32.totalorder %s2900_s23, %s2896_s22  ;;  %p195_p2 = scmp.eq.s32.totalorder %s2144_s29, 3 }
   0xa   : > { %s3944_s7 = smov (%p29_p0, %s28_s7), 0  ;;  %s3946_s8 = smov (!%p29_p0, %s31_s8), %s2916_s27 }
   0xb   : > { %3913 = sst [smem:[#allocation9_spill]] %s3944_s7  ;;  %p3017_p3 = por %p195_p2, %p194_p1 }
   0xc   : > { %p200_p4 = scmp.ne.s32.totalorder %s2896_s22, %s2892_s21  ;;  %p33_p5 = scmp.ge.s32.totalorder %s3946_s8, 2 }
   0xd   : > { %p201_p6 = scmp.eq.s32.totalorder %s2145_s30, 3  ;;  %p2148_p7 = scmp.ge.s32.totalorder %s2920_s28, 1 }
   0xe   : > { %p254_p8 = scmp.lt.s32.totalorder %s2920_s28, 5  ;;  %s3948_s8 = smov (%p33_p5, %s3946_s8), 0 }
   0xf   : > { %3915 = sst [smem:[#allocation10_spill]] %s3948_s8  ;;  %p3027_p9 = por %p201_p6, %p200_p4 }
  0x10   : > { %p255_p10 = pnand %p2148_p7, %p254_p8  ;;  %s181_s11 = ssub.s32 %s2916_s27, %s3948_s8 }
  0x11   : > { %s184_s12 = sadd.s32 1, %s2900_s23  ;;  %p182_p11 = scmp.eq.s32.totalorder %s181_s11, 0 }
  0x12   : > { %258 = sbr.rel (%p255_p10) target bundleno = 1574 (0x626), region = 44  ;;  %s3906_s14 = sand.u32 (!%p255_p10), 1, %s2896_s22  }
  0x13   : > { %s3035_s13 = scalar_select %p182_p11, %s2900_s23, %s184_s12  }
  0x14   : > { %p295_p12 = scmp.lt.s32.totalorder (!%p255_p10), %s2908_s25, 1  ;;  %s2149_s15 = sshll.u32 (!%p255_p10), %s3906_s14, 7 }
  0x15   : > { %3917 = sst [smem:[#allocation11_spill]] %s3035_s13  ;;  %s2152_s16 = sshll.u32 (!%p255_p10), %s2904_s24, 4 }
  0x16   : > { %p304_p13 = scmp.lt.s32.totalorder (!%p255_p10), %s2152_s16, 31  ;;  %p309_p0 = scmp.lt.s32.totalorder (!%p255_p10), %s2904_s24, 1 }
  0x17   : > { %s3068_s19 = scalar_lea.vmem (!%p255_p10), [#allocation3], %s2149_s15  ;;  %p2154_p1 = scmp.ne.s32.totalorder (!%p255_p10), %s2904_s24, 0 }
  0x19   : > { %s3043_s17 = scalar_select %p295_p12, %s2908_s25, 1 }
  0x1a   : > { %s3950_s16 = smov (!%p304_p13, %s2152_s16), 31  ;;  %316 = sbr.rel (%p2154_p1) target bundleno = 560 (0x230), region = 48 }
  0x1b   : > { %s297_s20 = scalar_lea.vmem %s3900_s2, %s3043_s17  ;;  %s2260_s29 = sshll.u32 %s3043_s17, 7  ;;  %v338_v19 = vld [vmem:[%s3898_s0] sm:$0xff] (!%p2154_p1)  ;;  %v339_v36 = vld [vmem:[%s3898_s0 + $0x8] sm:$0xff] (!%p2154_p1)  ;;  %v340_v37 = vld [vmem:[%s3898_s0 + $0x10] sm:$0xff] (!%p2154_p1) }
  0x1c   : > { %s3053_s12 = scalar_lea.vmem %s3901_s3, %s2260_s29  ;;  %s2153_s8 = sshll.u32 %s3950_s16, 3  ;;  %v3093_v20 = vld [vmem:[%s297_s20] ss:$0 sm:$0xff] (!%p2154_p1)  ;;  %v341_v40 = vld [vmem:[%s3898_s0 + $0x18] sm:$0xff] (!%p2154_p1)  ;;  %v343_v44 = vld [vmem:[%s3898_s0 + $0x28] sm:$0xff] (!%p2154_p1) }
  0x1d   : > { %s3058_s27 = scalar_lea.vmem %s3902_s4, %s2153_s8  ;;  %v682_v0 = vld [vmem:[%s3053_s12] sm:$0xff] (!%p2154_p1)  ;;  %v683_v1 = vld [vmem:[%s3053_s12 + $0x8] sm:$0xff] (!%p2154_p1)  ;;  %v684_v2 = vld [vmem:[%s3053_s12 + $0x10] sm:$0xff] (!%p2154_p1)  ;;  %s2922_s23 = smov (!%p2154_p1), 127   ;;  %v3096_v21 = vmul.f32 (!%p2154_p1), %v3093_v20, %v338_v19  ;;  %v3122_v38 = vmul.f32 (!%p2154_p1), %v3093_v20, %v339_v36  ;;  %v3125_v39 = vmul.f32 (!%p2154_p1), %v3093_v20, %v340_v37  ;;  %v3135_v42 = vmul.f32 (!%p2154_p1), %v3093_v20, %v341_v40 }
  0x1e   : > { %s3062_s26 = scalar_select %p309_p0, %s2904_s24, 1 }
  0x1f   : > { %v2695_v3 = vpack.i.bf16 (!%p2154_p1), %v683_v1, %v682_v0  ;;  %v685_v4 = vld [vmem:[%s3053_s12 + $0x18] sm:$0xff] (!%p2154_p1)  ;;  %v686_v5 = vld [vmem:[%s3053_s12 + $0x20] sm:$0xff] (!%p2154_p1)  ;;  %v687_v6 = vld [vmem:[%s3053_s12 + $0x28] sm:$0xff] (!%p2154_p1)  ;;  %v2550_v7 = vpack.c.bf16 (!%p2154_p1), %v683_v1, %v682_v0  ;;  %2438 = vmatprep.mubr.f32.mxu0 (!%p2154_p1), %v3096_v21  ;;  %v3149_v46 = vmul.f32 (!%p2154_p1), %v3093_v20, %v343_v44 }
  0x20   : > { %s311_s18 = scalar_lea.vmem %s3903_s5, %s3062_s26  ;;  %v2705_v8 = vpack.i.bf16 (!%p2154_p1), %v687_v6, %v686_v5  ;;  %v688_v9 = vld [vmem:[%s3053_s12 + $0x30] sm:$0xff] (!%p2154_p1)  ;;  %v689_v10 = vld [vmem:[%s3053_s12 + $0x38] sm:$0xff] (!%p2154_p1)  ;;  %v2554_v11 = vpack.c.bf16 (!%p2154_p1), %v685_v4, %v684_v2  ;;  %v2700_v12 = vpack.i.bf16 (!%p2154_p1), %v685_v4, %v684_v2  ;;  %v690_v14 = vld [vmem:[%s3053_s12 + $0x40] sm:$0xff] (!%p2154_p1)  ;;  %v2558_v18 = vpack.c.bf16 (!%p2154_p1), %v687_v6, %v686_v5 }
  0x21   : > { %2696 = vrot.lane.b32.xlu0 %v2695_v3, %s2922_s23  ;;  %2551 = vmatprep.subr.bf16.mxu0 %v2550_v7  ;;  %v2710_v13 = vpack.i.bf16 %v689_v10, %v688_v9  ;;  %v691_v15 = vld [vmem:[%s3053_s12 + $0x48] sm:$0xff]  ;;  %v692_v16 = vld [vmem:[%s3053_s12 + $0x50] sm:$0xff]  ;;  %v693_v17 = vld [vmem:[%s3053_s12 + $0x58] sm:$0xff]  ;;  %v2562_v28 = vpack.c.bf16 %v689_v10, %v688_v9  ;;  %v2923_v6 = vmov 0  }
  0x22   : > { %2706 = vrot.lane.b32.xlu1 %v2705_v8, %s2922_s23  ;;  %2553 = vmatpush3.bf16.msra.mxu0 %v2550_v7  ;;  %v2715_v22 = vpack.i.bf16 %v691_v15, %v690_v14  ;;  %v2720_v23 = vpack.i.bf16 %v693_v17, %v692_v16  ;;  %v694_v24 = vld [vmem:[%s3053_s12 + $0x60] sm:$0xff]  ;;  %v695_v25 = vld [vmem:[%s3053_s12 + $0x68] sm:$0xff]  ;;  %v696_v26 = vld [vmem:[%s3053_s12 + $0x70] sm:$0xff]  ;;  %v2566_v31 = vpack.c.bf16 %v691_v15, %v690_v14 }
  0x23   : > { %2555 = vmatprep.subr.bf16.mxu0 %v2554_v11  ;;  %v697_v27 = vld [vmem:[%s3053_s12 + $0x78] sm:$0xff]  ;;  %v2725_v29 = vpack.i.bf16 %v695_v25, %v694_v24  ;;  %v2570_v32 = vpack.c.bf16 %v693_v17, %v692_v16  ;;  %v2574_v33 = vpack.c.bf16 %v695_v25, %v694_v24  ;;  %v3112_v34 = vld [vmem:[%s3899_s1] sm:$0xff]  ;;  %v344_v45 = vld [vmem:[%s3898_s0 + $0x30] sm:$0xff]  ;;  %2736 = vset.pattern.permute.xlu0 %v2923_v6 }
  0x24   : > { %v2730_v30 = vpack.i.bf16 %v697_v27, %v696_v26  ;;  %2494 = vmatprep.mubr.f32.mxu1 %v3112_v34  ;;  %v2578_v35 = vpack.c.bf16 %v697_v27, %v696_v26  ;;  %v342_v41 = vld [vmem:[%s3898_s0 + $0x20] sm:$0xff]  ;;  %v3153_v47 = vmul.f32 %v3093_v20, %v344_v45  ;;  %v345_v48 = vld [vmem:[%s3898_s0 + $0x38] sm:$0xff]  ;;  %v347_v52 = vld [vmem:[%s3898_s0 + $0x48] sm:$0xff]  ;;  %2735 = vset.pattern.permute.xlu1 %v2923_v6 }
  0x25   : > { %2701 = vrot.lane.b32.xlu0 %v2700_v12, %s2922_s23  ;;  %v3139_v43 = vmul.f32 %v3093_v20, %v342_v41  ;;  %v346_v49 = vld [vmem:[%s3898_s0 + $0x40] sm:$0xff]  ;;  %v3163_v50 = vmul.f32 %v3093_v20, %v345_v48  ;;  %v348_v53 = vld [vmem:[%s3898_s0 + $0x50] sm:$0xff]  ;;  %v3177_v54 = vmul.f32 %v3093_v20, %v347_v52  ;;  %v349_v56 = vld [vmem:[%s3898_s0 + $0x58] sm:$0xff] }
  0x26   : > { %2711 = vrot.lane.b32.xlu1 %v2710_v13, %s2922_s23  ;;  %2557 = vmatpush3.bf16.msra.mxu0 %v2554_v11  ;;  %v3167_v51 = vmul.f32 %v3093_v20, %v346_v49  ;;  %v3181_v55 = vmul.f32 %v3093_v20, %v348_v53  ;;  %v350_v57 = vld [vmem:[%s3898_s0 + $0x60] sm:$0xff]  ;;  %v3191_v58 = vmul.f32 %v3093_v20, %v349_v56  ;;  %v351_v60 = vld [vmem:[%s3898_s0 + $0x68] sm:$0xff]  ;;  %v352_v61 = vld [vmem:[%s3898_s0 + $0x70] sm:$0xff] }
  0x27   : > { %2559 = vmatprep.subr.bf16.mxu0 %v2558_v18  ;;  %v3195_v59 = vmul.f32 %v3093_v20, %v350_v57  ;;  %v3205_v62 = vmul.f32 %v3093_v20, %v351_v60  ;;  %v3209_v63 = vmul.f32 %v3093_v20, %v352_v61  ;;  %v353_v0 = vld [vmem:[%s3898_s0 + $0x78] sm:$0xff]  ;;  %v3223_v37 = vld [vmem:[%s3899_s1 + $0x8] sm:$0xff]  ;;  %v3228_v40 = vld [vmem:[%s3899_s1 + $0x10] sm:$0xff] }
  0x28   : > { %v3216_v1 = vmul.f32 %v3093_v20, %v353_v0  ;;  %v3235_v41 = vld [vmem:[%s3899_s1 + $0x18] sm:$0xff]  ;;  %v3240_v44 = vld [vmem:[%s3899_s1 + $0x20] sm:$0xff]  ;;  %v3247_v45 = vld [vmem:[%s3899_s1 + $0x28] sm:$0xff] }
  0x29   : > { %2716 = vrot.lane.b32.xlu0 %v2715_v22, %s2922_s23  ;;  %v3252_v48 = vld [vmem:[%s3899_s1 + $0x30] sm:$0xff]  ;;  %v3259_v49 = vld [vmem:[%s3899_s1 + $0x38] sm:$0xff]  ;;  %v3264_v52 = vld [vmem:[%s3899_s1 + $0x40] sm:$0xff] }
  0x2a   : > { %2721 = vrot.lane.b32.xlu1 %v2720_v23, %s2922_s23  ;;  %2561 = vmatpush3.bf16.msra.mxu0 %v2558_v18  ;;  %v3271_v53 = vld [vmem:[%s3899_s1 + $0x48] sm:$0xff]  ;;  %v3276_v56 = vld [vmem:[%s3899_s1 + $0x50] sm:$0xff]  ;;  %v3283_v57 = vld [vmem:[%s3899_s1 + $0x58] sm:$0xff] }
  0x2b   : > { %2563 = vmatprep.subr.bf16.mxu0 %v2562_v28  ;;  %v3288_v60 = vld [vmem:[%s3899_s1 + $0x60] sm:$0xff]  ;;  %v3295_v61 = vld [vmem:[%s3899_s1 + $0x68] sm:$0xff]  ;;  %v3300_v0 = vld [vmem:[%s3899_s1 + $0x70] sm:$0xff] }
  0x2d   : > { %2726 = vrot.lane.b32.xlu0 %v2725_v29, %s2922_s23 }
  0x2e   : > { %2731 = vrot.lane.b32.xlu1 %v2730_v30, %s2922_s23  ;;  %2565 = vmatpush3.bf16.msra.mxu0 %v2562_v28 }
  0x2f   : > { %2567 = vmatprep.subr.bf16.mxu0 %v2566_v31 }
  0x32   : > { %2569 = vmatpush3.bf16.msra.mxu0 %v2566_v31 }
  0x33   : > { %2571 = vmatprep.subr.bf16.mxu0 %v2570_v32 }
  0x36   : > { %2573 = vmatpush3.bf16.msra.mxu0 %v2570_v32 }
  0x37   : > { %2575 = vmatprep.subr.bf16.mxu0 %v2574_v33 }
  0x3a   : > { %2577 = vmatpush3.bf16.msra.mxu0 %v2574_v33 }
  0x3b   : > { %2579 = vmatprep.subr.bf16.mxu0 %v2578_v35 }
  0x3e   : > { %2581 = vmatpush3.bf16.msra.mxu0 %v2578_v35 }
  0x41   : > { %2439 = vmatmul.mubr.f32.vlgmr.msra.gmra.mrb[0].mxu0 %v3122_v38 }
  0x42   : > { %2441 = vmatprep.mubr.f32.mxu0 %v3125_v39 }
  0x45   : > { %2442 = vmatmul.mubr.f32.gmra.mrb[2].mxu0 %v3135_v42 }
  0x46   : > { %2444 = vmatprep.mubr.f32.mxu0 %v3139_v43 }
  0x49   : > { %2445 = vmatmul.mubr.f32.gmra.mrb[4].mxu0 %v3149_v46 }
  0x4a   : > { %2447 = vmatprep.mubr.f32.mxu0 %v3153_v47 }
  0x4d   : > { %2448 = vmatmul.mubr.f32.gmra.mrb[6].mxu0 %v3163_v50 }
  0x4e   : > { %2450 = vmatprep.mubr.f32.mxu0 %v3167_v51 }
  0x51   : > { %2451 = vmatmul.mubr.f32.gmra.mrb[8].mxu0 %v3177_v54 }
  0x52   : > { %2453 = vmatprep.mubr.f32.mxu0 %v3181_v55 }
  0x55   : > { %2454 = vmatmul.mubr.f32.gmra.mrb[10].mxu0 %v3191_v58 }
  0x56   : > { %2456 = vmatprep.mubr.f32.mxu0 %v3195_v59 }
  0x59   : > { %2457 = vmatmul.mubr.f32.gmra.mrb[12].mxu0 %v3205_v62 }
  0x5a   : > { %2459 = vmatprep.mubr.f32.mxu0 %v3209_v63 }
  0x5d   : > { %2460 = vmatmul.mubr.f32.gmra.mrb[14].mxu0 %v3216_v1 }
  0x93   : > { %v2697_v2 = vpop.permute.xlu0 %2696 }
  0x94   : > { %v2699_v3 = vunpack.i.h.bf16 %v2697_v2  ;;  %v2698_v4 = vunpack.i.l.bf16 %v2697_v2  ;;  %v2707_v5 = vpop.permute.xlu1 %2706  ;;  %v3307_v2 = vld [vmem:[%s3899_s1 + $0x78] sm:$0xff] }
  0x95   : > { %v2709_v8 = vunpack.i.h.bf16 %v2707_v5  ;;  %v2708_v9 = vunpack.i.l.bf16 %v2707_v5 }
  0x96   : > { %v2582_v7 = vpack.c.bf16 %v2699_v3, %v2698_v4 }
  0x97   : > { %v2702_v10 = vpop.permute.xlu0 %2701  ;;  %v2590_v15 = vpack.c.bf16 %v2709_v8, %v2708_v9 }
  0x98   : > { %v2704_v11 = vunpack.i.h.bf16 %v2702_v10  ;;  %v2703_v12 = vunpack.i.l.bf16 %v2702_v10  ;;  %2583 = vmatprep.subr.bf16.mxu1 %v2582_v7  ;;  %v2712_v13 = vpop.permute.xlu1 %2711 }
  0x99   : > { %2585 = vmatpush3.bf16.msra.mxu1 %v2582_v7  ;;  %v2714_v16 = vunpack.i.h.bf16 %v2712_v13  ;;  %v2713_v17 = vunpack.i.l.bf16 %v2712_v13 }
  0x9a   : > { %v2586_v14 = vpack.c.bf16 %v2704_v11, %v2703_v12 }
  0x9b   : > { %v2717_v18 = vpop.permute.xlu0 %2716  ;;  %v2594_v19 = vpack.c.bf16 %v2714_v16, %v2713_v17 }
  0x9c   : > { %2587 = vmatprep.subr.bf16.mxu1 %v2586_v14  ;;  %v2719_v20 = vunpack.i.h.bf16 %v2717_v18  ;;  %v2718_v22 = vunpack.i.l.bf16 %v2717_v18  ;;  %v2722_v23 = vpop.permute.xlu1 %2721 }
  0x9d   : > { %2589 = vmatpush3.bf16.msra.mxu1 %v2586_v14  ;;  %v2724_v25 = vunpack.i.h.bf16 %v2722_v23  ;;  %v2723_v26 = vunpack.i.l.bf16 %v2722_v23 }
  0x9e   : > { %2591 = vmatprep.subr.bf16.mxu1 %v2590_v15  ;;  %v2598_v24 = vpack.c.bf16 %v2719_v20, %v2718_v22  ;;  %v333_v20 = vlaneseq }
  0x9f   : > { %v2727_v27 = vpop.permute.xlu0 %2726  ;;  %v2602_v28 = vpack.c.bf16 %v2724_v25, %v2723_v26 }
  0xa0   : > { %v2729_v29 = vunpack.i.h.bf16 %v2727_v27  ;;  %v2728_v30 = vunpack.i.l.bf16 %v2727_v27  ;;  %v2732_v31 = vpop.permute.xlu1 %2731  ;;  %v334_v23 = vand.u32 127, %v333_v20 }
  0xa1   : > { %2593 = vmatpush3.bf16.msra.mxu1 %v2590_v15  ;;  %v2734_v33 = vunpack.i.h.bf16 %v2732_v31  ;;  %v2733_v35 = vunpack.i.l.bf16 %v2732_v31  ;;  %v2924_v15 = vmov 0.0  }
  0xa2   : > { %2595 = vmatprep.subr.bf16.mxu1 %v2594_v19  ;;  %v2606_v32 = vpack.c.bf16 %v2729_v29, %v2728_v30  ;;  %317 = vst [vmem:[%s3068_s19] sm:$0xff] %v2924_v15  ;;  %318 = vst [vmem:[%s3068_s19 + $0x8] sm:$0xff] %v2924_v15  ;;  %vm335_vm0 = vcmp.eq.s32.totalorder %v334_v23, 32 }
  0xa3   : > { %v2610_v36 = vpack.c.bf16 %v2734_v33, %v2733_v35  ;;  %319 = vst [vmem:[%s3068_s19 + $0x10] sm:$0xff] %v2924_v15  ;;  %320 = vst [vmem:[%s3068_s19 + $0x18] sm:$0xff] %v2924_v15  ;;  %v3326_v27 = vsel %vm335_vm0, 1.0, %v2924_v15 }
  0xa4   : > { %321 = vst [vmem:[%s3068_s19 + $0x20] sm:$0xff] %v2924_v15  ;;  %322 = vst [vmem:[%s3068_s19 + $0x28] sm:$0xff] %v2924_v15 }
  0xa5   : > { %2597 = vmatpush3.bf16.msra.mxu1 %v2594_v19  ;;  %323 = vst [vmem:[%s3068_s19 + $0x30] sm:$0xff] %v2924_v15  ;;  %324 = vst [vmem:[%s3068_s19 + $0x38] sm:$0xff] %v2924_v15 }
  0xa6   : > { %2599 = vmatprep.subr.bf16.mxu1 %v2598_v24  ;;  %325 = vst [vmem:[%s3068_s19 + $0x40] sm:$0xff] %v2924_v15  ;;  %326 = vst [vmem:[%s3068_s19 + $0x48] sm:$0xff] %v2924_v15 }
  0xa7   : > { %327 = vst [vmem:[%s3068_s19 + $0x50] sm:$0xff] %v2924_v15  ;;  %328 = vst [vmem:[%s3068_s19 + $0x58] sm:$0xff] %v2924_v15 }
  0xa8   : > { %329 = vst [vmem:[%s3068_s19 + $0x60] sm:$0xff] %v2924_v15  ;;  %330 = vst [vmem:[%s3068_s19 + $0x68] sm:$0xff] %v2924_v15 }
  0xa9   : > { %2601 = vmatpush3.bf16.msra.mxu1 %v2598_v24  ;;  %331 = vst [vmem:[%s3068_s19 + $0x70] sm:$0xff] %v2924_v15  ;;  %332 = vst [vmem:[%s3068_s19 + $0x78] sm:$0xff] %v2924_v15 }
  0xaa   : > { %2603 = vmatprep.subr.bf16.mxu1 %v2602_v28 }
  0xad   : > { %2605 = vmatpush3.bf16.msra.mxu1 %v2602_v28 }
  0xae   : > { %2607 = vmatprep.subr.bf16.mxu1 %v2606_v32 }
  0xb1   : > { %2609 = vmatpush3.bf16.msra.mxu1 %v2606_v32 }
  0xb2   : > { %2611 = vmatprep.subr.bf16.mxu1 %v2610_v36 }
  0xb5   : > { %2613 = vmatpush3.bf16.msra.mxu1 %v2610_v36 }
  0xb8   : > { %2495 = vmatmul.mubr.f32.vlgmr.msra.gmra.mrb[0].mxu1 %v3223_v37 }
  0xb9   : > { %2497 = vmatprep.mubr.f32.mxu1 %v3228_v40 }
  0xbc   : > { %2498 = vmatmul.mubr.f32.gmra.mrb[2].mxu1 %v3235_v41 }
  0xbd   : > { %2500 = vmatprep.mubr.f32.mxu1 %v3240_v44 }
  0xc0   : > { %2501 = vmatmul.mubr.f32.gmra.mrb[4].mxu1 %v3247_v45 }
  0xc1   : > { %2503 = vmatprep.mubr.f32.mxu1 %v3252_v48 }
  0xc4   : > { %2504 = vmatmul.mubr.f32.gmra.mrb[6].mxu1 %v3259_v49 }
  0xc5   : > { %2506 = vmatprep.mubr.f32.mxu1 %v3264_v52 }
  0xc8   : > { %2507 = vmatmul.mubr.f32.gmra.mrb[8].mxu1 %v3271_v53 }
  0xc9   : > { %2509 = vmatprep.mubr.f32.mxu1 %v3276_v56 }
  0xcc   : > { %2510 = vmatmul.mubr.f32.gmra.mrb[10].mxu1 %v3283_v57 }
  0xcd   : > { %2512 = vmatprep.mubr.f32.mxu1 %v3288_v60 }
  0xd0   : > { %2513 = vmatmul.mubr.f32.gmra.mrb[12].mxu1 %v3295_v61 }
  0xd1   : > { %2515 = vmatprep.mubr.f32.mxu1 %v3300_v0 }
  0xd4   : > { %2516 = vmatmul.mubr.f32.gmra.mrb[14].mxu1 %v3307_v2 }
 0x114   : > { %v2440_v3 = vpop.f32.mrb[0].mxu0 }
 0x115   : > { %v459_v4 = vpop.f32.mrb[1].mxu0  ;;  %545 = vperm.xlu1 %2735, %v2440_v3  }
 0x116   : > { %540 = vperm.xlu0 %2736, %v459_v4  }
 0x118   : > { %v2443_v5 = vpop.f32.mrb[2].mxu0 }
 0x119   : > { %v469_v6 = vpop.f32.mrb[3].mxu0 }
 0x11a   : > { %555 = vperm.xlu0 %2736, %v2443_v5   ;;  %550 = vperm.xlu1 %2735, %v469_v6  }
 0x11c   : > { %v2446_v7 = vpop.f32.mrb[4].mxu0 }
 0x11d   : > { %v479_v8 = vpop.f32.mrb[5].mxu0 }
 0x11e   : > { %565 = vperm.xlu0 %2736, %v2446_v7   ;;  %560 = vperm.xlu1 %2735, %v479_v8  }
 0x120   : > { %v2449_v9 = vpop.f32.mrb[6].mxu0 }
 0x121   : > { %v489_v10 = vpop.f32.mrb[7].mxu0 }
 0x122   : > { %575 = vperm.xlu0 %2736, %v2449_v9   ;;  %570 = vperm.xlu1 %2735, %v489_v10  }
 0x124   : > { %v2452_v11 = vpop.f32.mrb[8].mxu0 }
 0x125   : > { %v499_v12 = vpop.f32.mrb[9].mxu0 }
 0x126   : > { %585 = vperm.xlu0 %2736, %v2452_v11   ;;  %580 = vperm.xlu1 %2735, %v499_v12  }
 0x128   : > { %v2455_v13 = vpop.f32.mrb[10].mxu0 }
 0x129   : > { %v509_v14 = vpop.f32.mrb[11].mxu0 }
 0x12a   : > { %595 = vperm.xlu0 %2736, %v2455_v13   ;;  %590 = vperm.xlu1 %2735, %v509_v14  }
 0x12c   : > { %v2458_v16 = vpop.f32.mrb[12].mxu0 }
 0x12d   : > { %v519_v17 = vpop.f32.mrb[13].mxu0 }
 0x12e   : > { %605 = vperm.xlu0 %2736, %v2458_v16   ;;  %600 = vperm.xlu1 %2735, %v519_v17  }
 0x130   : > { %v2461_v18 = vpop.f32.mrb[14].mxu0 }
 0x131   : > { %v529_v19 = vpop.f32.mrb[15].mxu0 }
 0x132   : > { %615 = vperm.xlu0 %2736, %v2461_v18   ;;  %610 = vperm.xlu1 %2735, %v529_v19  }
 0x18b   : > { %v2496_v22 = vpop.f32.mrb[0].mxu1 }
 0x18c   : > { %v828_v24 = vpop.f32.mrb[1].mxu1  ;;  %914 = vperm.xlu0 %2736, %v2496_v22  }
 0x18d   : > { %909 = vperm.xlu1 %2735, %v828_v24  }
 0x18f   : > { %v2499_v25 = vpop.f32.mrb[2].mxu1 }
 0x190   : > { %v838_v26 = vpop.f32.mrb[3].mxu1  ;;  %924 = vperm.xlu0 %2736, %v2499_v25  }
 0x191   : > { %919 = vperm.xlu1 %2735, %v838_v26  }
 0x193   : > { %v2502_v28 = vpop.f32.mrb[4].mxu1 }
 0x194   : > { %v848_v29 = vpop.f32.mrb[5].mxu1  ;;  %934 = vperm.xlu0 %2736, %v2502_v28   ;;  %v546_v30 = vpop.permute.xlu1 %545 }
 0x195   : > { %929 = vperm.xlu1 %2735, %v848_v29   ;;  %v619_v31 = vmul.f32 %v3326_v27, %v546_v30  ;;  %v541_v32 = vpop.permute.xlu0 %540 }
 0x196   : > { %v618_v33 = vmul.f32 %v3326_v27, %v541_v32 }
 0x197   : > { %v2505_v35 = vpop.f32.mrb[6].mxu1  ;;  %v635_v36 = vadd.f32 %v619_v31, %v3122_v38 }
 0x198   : > { %v858_v3 = vpop.f32.mrb[7].mxu1  ;;  %944 = vperm.xlu0 %2736, %v2505_v35   ;;  %v634_v4 = vadd.f32 %v618_v33, %v3096_v21 }
 0x199   : > { %939 = vperm.xlu1 %2735, %v858_v3   ;;  %v556_v5 = vpop.permute.xlu0 %555  ;;  %v551_v6 = vpop.permute.xlu1 %550 }
 0x19a   : > { %v650_v7 = vpack.c.bf16 %v635_v36, %v634_v4  ;;  %v621_v8 = vmul.f32 %v3326_v27, %v556_v5  ;;  %v620_v9 = vmul.f32 %v3326_v27, %v551_v6 }
 0x19b   : > { %v2508_v10 = vpop.f32.mrb[8].mxu1 }
 0x19c   : > { %v868_v11 = vpop.f32.mrb[9].mxu1  ;;  %954 = vperm.xlu0 %2736, %v2508_v10   ;;  %658 = vst [vmem:[#allocation2] sm:$0xff] %v650_v7  ;;  %v637_v12 = vadd.f32 %v621_v8, %v3135_v42  ;;  %v636_v38 = vadd.f32 %v620_v9, %v3125_v39 }
 0x19d   : > { %949 = vperm.xlu1 %2735, %v868_v11   ;;  %v566_v13 = vpop.permute.xlu0 %565  ;;  %v561_v14 = vpop.permute.xlu1 %560 }
 0x19e   : > { %v651_v21 = vpack.c.bf16 %v637_v12, %v636_v38  ;;  %v623_v15 = vmul.f32 %v3326_v27, %v566_v13  ;;  %v622_v16 = vmul.f32 %v3326_v27, %v561_v14 }
 0x19f   : > { %v2511_v17 = vpop.f32.mrb[10].mxu1 }
 0x1a0   : > { %v878_v18 = vpop.f32.mrb[11].mxu1  ;;  %964 = vperm.xlu0 %2736, %v2511_v17   ;;  %659 = vst [vmem:[#allocation2 + $0x8] sm:$0xff] %v651_v21  ;;  %v639_v19 = vadd.f32 %v623_v15, %v3149_v46  ;;  %v638_v20 = vadd.f32 %v622_v16, %v3139_v43 }
 0x1a1   : > { %959 = vperm.xlu1 %2735, %v878_v18   ;;  %v576_v42 = vpop.permute.xlu0 %575  ;;  %v571_v22 = vpop.permute.xlu1 %570 }
 0x1a2   : > { %v652_v39 = vpack.c.bf16 %v639_v19, %v638_v20  ;;  %v625_v23 = vmul.f32 %v3326_v27, %v576_v42  ;;  %v624_v24 = vmul.f32 %v3326_v27, %v571_v22 }
 0x1a3   : > { %v2514_v25 = vpop.f32.mrb[12].mxu1 }
 0x1a4   : > { %v888_v26 = vpop.f32.mrb[13].mxu1  ;;  %974 = vperm.xlu0 %2736, %v2514_v25   ;;  %660 = vst [vmem:[#allocation2 + $0x10] sm:$0xff] %v652_v39  ;;  %v641_v28 = vadd.f32 %v625_v23, %v3163_v50  ;;  %v640_v29 = vadd.f32 %v624_v24, %v3153_v47 }
 0x1a5   : > { %969 = vperm.xlu1 %2735, %v888_v26   ;;  %v586_v46 = vpop.permute.xlu0 %585  ;;  %v581_v30 = vpop.permute.xlu1 %580 }
 0x1a6   : > { %v653_v43 = vpack.c.bf16 %v641_v28, %v640_v29  ;;  %v627_v31 = vmul.f32 %v3326_v27, %v586_v46  ;;  %v626_v32 = vmul.f32 %v3326_v27, %v581_v30 }
 0x1a7   : > { %v2517_v33 = vpop.f32.mrb[14].mxu1 }
 0x1a8   : > { %v898_v35 = vpop.f32.mrb[15].mxu1  ;;  %984 = vperm.xlu0 %2736, %v2517_v33   ;;  %661 = vst [vmem:[#allocation2 + $0x18] sm:$0xff] %v653_v43  ;;  %v643_v36 = vadd.f32 %v627_v31, %v3177_v54  ;;  %v642_v3 = vadd.f32 %v626_v32, %v3167_v51 }
 0x1a9   : > { %979 = vperm.xlu1 %2735, %v898_v35   ;;  %v596_v50 = vpop.permute.xlu0 %595  ;;  %v591_v4 = vpop.permute.xlu1 %590 }
 0x1aa   : > { %v654_v47 = vpack.c.bf16 %v643_v36, %v642_v3  ;;  %v629_v5 = vmul.f32 %v3326_v27, %v596_v50  ;;  %v628_v6 = vmul.f32 %v3326_v27, %v591_v4 }
 0x1ac   : > { %662 = vst [vmem:[#allocation2 + $0x20] sm:$0xff] %v654_v47  ;;  %v645_v7 = vadd.f32 %v629_v5, %v3191_v58  ;;  %v644_v8 = vadd.f32 %v628_v6, %v3181_v55 }
 0x1ad   : > { %v606_v9 = vpop.permute.xlu0 %605  ;;  %v601_v10 = vpop.permute.xlu1 %600 }
 0x1ae   : > { %v655_v11 = vpack.c.bf16 %v645_v7, %v644_v8  ;;  %v631_v54 = vmul.f32 %v3326_v27, %v606_v9  ;;  %v630_v51 = vmul.f32 %v3326_v27, %v601_v10 }
 0x1b0   : > { %663 = vst [vmem:[#allocation2 + $0x28] sm:$0xff] %v655_v11  ;;  %v647_v12 = vadd.f32 %v631_v54, %v3205_v62  ;;  %v646_v38 = vadd.f32 %v630_v51, %v3195_v59 }
 0x1b1   : > { %v616_v13 = vpop.permute.xlu0 %615  ;;  %v611_v14 = vpop.permute.xlu1 %610 }
 0x1b2   : > { %v656_v21 = vpack.c.bf16 %v647_v12, %v646_v38  ;;  %v633_v15 = vmul.f32 %v3326_v27, %v616_v13  ;;  %v632_v58 = vmul.f32 %v3326_v27, %v611_v14 }
 0x1b4   : > { %664 = vst [vmem:[#allocation2 + $0x30] sm:$0xff] %v656_v21  ;;  %v649_v55 = vadd.f32 %v633_v15, %v3216_v1  ;;  %v648_v16 = vadd.f32 %v632_v58, %v3209_v63 }
 0x1b6   : > { %v657_v17 = vpack.c.bf16 %v649_v55, %v648_v16 }
 0x1b8   : > { %665 = vst [vmem:[#allocation2 + $0x38] sm:$0xff] %v657_v17 }
 0x20b   : > { %v915_v18 = vpop.permute.xlu0 %914 }
 0x20c   : > { %v988_v19 = vmul.f32 %v3326_v27, %v915_v18  ;;  %v910_v62 = vpop.permute.xlu1 %909 }
 0x20d   : > { %v987_v59 = vmul.f32 %v3326_v27, %v910_v62 }
 0x20e   : > { %v1004_v20 = vsub.f32 %v988_v19, %v3223_v37 }
 0x20f   : > { %v1003_v42 = vsub.f32 %v987_v59, %v3112_v34  ;;  %v925_v22 = vpop.permute.xlu0 %924 }
 0x210   : > { %v990_v39 = vmul.f32 %v3326_v27, %v925_v22  ;;  %v920_v23 = vpop.permute.xlu1 %919 }
 0x211   : > { %v1019_v24 = vpack.c.bf16 %v1004_v20, %v1003_v42  ;;  %v989_v1 = vmul.f32 %v3326_v27, %v920_v23 }
 0x212   : > { %v1006_v63 = vsub.f32 %v990_v39, %v3235_v41 }
 0x213   : > { %1027 = vst [vmem:[#allocation2 + $0x40] sm:$0xff] %v1019_v24  ;;  %v1005_v25 = vsub.f32 %v989_v1, %v3228_v40  ;;  %v935_v26 = vpop.permute.xlu0 %934 }
 0x214   : > { %v992_v28 = vmul.f32 %v3326_v27, %v935_v26  ;;  %v930_v29 = vpop.permute.xlu1 %929 }
 0x215   : > { %v1020_v46 = vpack.c.bf16 %v1006_v63, %v1005_v25  ;;  %v991_v37 = vmul.f32 %v3326_v27, %v930_v29 }
 0x216   : > { %v1008_v34 = vsub.f32 %v992_v28, %v3247_v45 }
 0x217   : > { %1028 = vst [vmem:[#allocation2 + $0x48] sm:$0xff] %v1020_v46  ;;  %v1007_v30 = vsub.f32 %v991_v37, %v3240_v44  ;;  %v945_v43 = vpop.permute.xlu0 %944 }
 0x218   : > { %v994_v31 = vmul.f32 %v3326_v27, %v945_v43  ;;  %v940_v32 = vpop.permute.xlu1 %939 }
 0x219   : > { %v1021_v41 = vpack.c.bf16 %v1008_v34, %v1007_v30  ;;  %v993_v33 = vmul.f32 %v3326_v27, %v940_v32 }
 0x21a   : > { %v1010_v40 = vsub.f32 %v994_v31, %v3259_v49 }
 0x21b   : > { %1029 = vst [vmem:[#allocation2 + $0x50] sm:$0xff] %v1021_v41  ;;  %v1009_v35 = vsub.f32 %v993_v33, %v3252_v48  ;;  %v955_v36 = vpop.permute.xlu0 %954 }
 0x21c   : > { %v996_v3 = vmul.f32 %v3326_v27, %v955_v36  ;;  %v950_v50 = vpop.permute.xlu1 %949 }
 0x21d   : > { %v1022_v45 = vpack.c.bf16 %v1010_v40, %v1009_v35  ;;  %v995_v4 = vmul.f32 %v3326_v27, %v950_v50 }
 0x21e   : > { %v1012_v44 = vsub.f32 %v996_v3, %v3271_v53 }
 0x21f   : > { %1030 = vst [vmem:[#allocation2 + $0x58] sm:$0xff] %v1022_v45  ;;  %v1011_v47 = vsub.f32 %v995_v4, %v3264_v52  ;;  %v965_v5 = vpop.permute.xlu0 %964 }
 0x220   : > { %v998_v6 = vmul.f32 %v3326_v27, %v965_v5  ;;  %v960_v7 = vpop.permute.xlu1 %959 }
 0x221   : > { %v1023_v49 = vpack.c.bf16 %v1012_v44, %v1011_v47  ;;  %v997_v8 = vmul.f32 %v3326_v27, %v960_v7 }
 0x222   : > { %v1014_v48 = vsub.f32 %v998_v6, %v3283_v57 }
 0x223   : > { %1031 = vst [vmem:[#allocation2 + $0x60] sm:$0xff] %v1023_v49  ;;  %v1013_v9 = vsub.f32 %v997_v8, %v3276_v56  ;;  %v975_v10 = vpop.permute.xlu0 %974 }
 0x224   : > { %v1000_v11 = vmul.f32 %v3326_v27, %v975_v10  ;;  %v970_v54 = vpop.permute.xlu1 %969 }
 0x225   : > { %v1024_v53 = vpack.c.bf16 %v1014_v48, %v1013_v9  ;;  %v999_v51 = vmul.f32 %v3326_v27, %v970_v54 }
 0x226   : > { %v1016_v52 = vsub.f32 %v1000_v11, %v3295_v61 }
 0x227   : > { %1032 = vst [vmem:[#allocation2 + $0x68] sm:$0xff] %v1024_v53  ;;  %v1015_v12 = vsub.f32 %v999_v51, %v3288_v60  ;;  %v985_v38 = vpop.permute.xlu0 %984 }
 0x228   : > { %v1002_v13 = vmul.f32 %v3326_v27, %v985_v38  ;;  %v980_v14 = vpop.permute.xlu1 %979 }
 0x229   : > { %v1025_v57 = vpack.c.bf16 %v1016_v52, %v1015_v12  ;;  %v1001_v21 = vmul.f32 %v3326_v27, %v980_v14 }
 0x22a   : > { %v1018_v56 = vsub.f32 %v1002_v13, %v3307_v2 }
 0x22b   : > { %1033 = vst [vmem:[#allocation2 + $0x70] sm:$0xff] %v1025_v57  ;;  %v1017_v15 = vsub.f32 %v1001_v21, %v3300_v0 }
 0x22d   : > { %v1026_v58 = vpack.c.bf16 %v1018_v56, %v1017_v15 }
 0x22f   : > { %1034 = vst [vmem:[#allocation2 + $0x78] sm:$0xff] %v1026_v58 }
 0x230 PF: > { %v1035_v60 = vld [vmem:[%s3058_s27] sm:$0xff]  ;;  %v2925_v61 = vmov 1   ;;  %v2926_v55 = vmov 2   ;;  %v1036_v2 = vld [vmem:[%s3058_s27 + $0x8] sm:$0xff]  ;;  %v1037_v17 = vld [vmem:[%s3058_s27 + $0x10] sm:$0xff]  ;;  %v1052_v35 = vlaneseq  ;;  %p2254_p2 = scmp.ne.s32.totalorder %s2904_s24, 1 }
 0x231   : > { %2738 = vset.pattern.permute.xlu1 %v2925_v61  ;;  %2737 = vset.pattern.permute.xlu0 %v2926_v55  ;;  %v1412_v27 = vld [vmem:[#allocation2 + $0x40] sm:$0xff]  ;;  %v1413_v0 = vld [vmem:[#allocation2 + $0x48] sm:$0xff]  ;;  %v1038_v18 = vld [vmem:[%s3058_s27 + $0x18] sm:$0xff]  ;;  %v2927_v6 = vmov 1.0|1.0  }
 0x232   : > { %1136 = vperm.xlu1 %2738, %v1035_v60   ;;  %1056 = vperm.xlu0 %2737, %v1035_v60   ;;  %v1404_v16 = vld [vmem:[#allocation2] sm:$0xff]  ;;  %v1405_v19 = vld [vmem:[#allocation2 + $0x8] sm:$0xff]  ;;  %v1414_v62 = vld [vmem:[#allocation2 + $0x50] sm:$0xff]  ;;  %v3430_v36 = vand.u32 127, %v1052_v35 }
 0x233   : > { %2326 = vmatprep.subr.bf16.mxu0 %v1412_v27  ;;  %v1406_v59 = vld [vmem:[#allocation2 + $0x10] sm:$0xff]  ;;  %v1415_v20 = vld [vmem:[#allocation2 + $0x58] sm:$0xff]  ;;  %v1039_v39 = vld [vmem:[%s3058_s27 + $0x20] sm:$0xff] }
 0x234   : > { %2327 = vmatpush3.bf16.msra.mxu0 %v1404_v16  ;;  %v1041_v42 = vld [vmem:[%s3058_s27 + $0x30] sm:$0xff]  ;;  %v1407_v22 = vld [vmem:[#allocation2 + $0x18] sm:$0xff]  ;;  %v1416_v23 = vld [vmem:[#allocation2 + $0x60] sm:$0xff]  ;;  %v3433_v3 = vadd.s32 128, %v3430_v36 }
 0x235   : > { %2328 = vmatprep.subr.bf16.mxu0 %v1413_v0  ;;  %v1040_v24 = vld [vmem:[%s3058_s27 + $0x28] sm:$0xff]  ;;  %v1408_v1 = vld [vmem:[#allocation2 + $0x20] sm:$0xff]  ;;  %v1418_v26 = vld [vmem:[#allocation2 + $0x70] sm:$0xff] }
 0x236   : > { %1139 = vperm.xlu1 %2738, %v1036_v2   ;;  %1059 = vperm.xlu0 %2737, %v1036_v2   ;;  %v1417_v63 = vld [vmem:[#allocation2 + $0x68] sm:$0xff]  ;;  %v1410_v29 = vld [vmem:[#allocation2 + $0x30] sm:$0xff]  ;;  %v1419_v46 = vld [vmem:[#allocation2 + $0x78] sm:$0xff] }
 0x237   : > { %v1409_v25 = vld [vmem:[#allocation2 + $0x28] sm:$0xff]  ;;  %v1042_v37 = vld [vmem:[%s3058_s27 + $0x38] sm:$0xff]  ;;  %v1045_v30 = vld [vmem:[%s3058_s27 + $0x50] sm:$0xff] }
 0x238   : > { %2329 = vmatpush3.bf16.msra.mxu0 %v1405_v19  ;;  %v1044_v28 = vld [vmem:[%s3058_s27 + $0x48] sm:$0xff]  ;;  %v1411_v34 = vld [vmem:[#allocation2 + $0x38] sm:$0xff]  ;;  %v1043_v43 = vld [vmem:[%s3058_s27 + $0x40] sm:$0xff] }
 0x239   : > { %2330 = vmatprep.subr.bf16.mxu0 %v1414_v62  ;;  %v1048_v31 = vld [vmem:[%s3058_s27 + $0x68] sm:$0xff]  ;;  %v1049_v32 = vld [vmem:[%s3058_s27 + $0x70] sm:$0xff]  ;;  %v1046_v41 = vld [vmem:[%s3058_s27 + $0x58] sm:$0xff] }
 0x23a   : > { %2739 = vset.pattern.permute.xlu1 %v2926_v55  ;;  %1062 = vperm.xlu0 %2737, %v1037_v17   ;;  %v1047_v33 = vld [vmem:[%s3058_s27 + $0x60] sm:$0xff]  ;;  %v1050_v40 = vld [vmem:[%s3058_s27 + $0x78] sm:$0xff] }
 0x23b   : > { %1065 = vperm.xlu1 %2739, %v1038_v18  }
 0x23c   : > { %2331 = vmatpush3.bf16.msra.mxu0 %v1406_v59 }
 0x23d   : > { %2332 = vmatprep.subr.bf16.mxu0 %v1415_v20 }
 0x23e   : > { %2740 = vset.pattern.permute.xlu0 %v2925_v61 }
 0x23f   : > { %2741 = vset.pattern.permute.xlu1 %v2925_v61  ;;  %1142 = vperm.xlu0 %2740, %v1037_v17   ;;  %v2928_v17 = vmov 32  }
 0x240   : > { %1145 = vperm.xlu1 %2741, %v1038_v18   ;;  %2333 = vmatpush3.bf16.msra.mxu0 %v1407_v22 }
 0x241   : > { %2334 = vmatprep.subr.bf16.mxu0 %v1416_v23 }
 0x243   : > { %1154 = vperm.xlu0 %2740, %v1041_v42  }
 0x244   : > { %2742 = vset.pattern.permute.xlu1 %v2926_v55  ;;  %2335 = vmatpush3.bf16.msra.mxu0 %v1408_v1 }
 0x245   : > { %1068 = vperm.xlu1 %2742, %v1039_v39   ;;  %2336 = vmatprep.subr.bf16.mxu0 %v1417_v63 }
 0x247   : > { %2745 = vset.pattern.permute.xlu0 %v2926_v55 }
 0x248   : > { %1071 = vperm.xlu0 %2745, %v1040_v24   ;;  %2337 = vmatpush3.bf16.msra.mxu0 %v1409_v25 }
 0x249   : > { %2743 = vset.pattern.permute.xlu1 %v2925_v61  ;;  %2338 = vmatprep.subr.bf16.mxu0 %v1418_v26 }
 0x24a   : > { %1148 = vperm.xlu1 %2743, %v1039_v39  }
 0x24c   : > { %1074 = vperm.xlu0 %2745, %v1041_v42   ;;  %2339 = vmatpush3.bf16.msra.mxu0 %v1410_v29 }
 0x24d   : > { %2340 = vmatprep.subr.bf16.mxu0 %v1419_v46 }
 0x24e   : > { %1151 = vperm.xlu1 %2743, %v1040_v24  }
 0x250   : > { %1083 = vperm.xlu0 %2745, %v1044_v28   ;;  %2341 = vmatpush3.bf16.msra.mxu0 %v1411_v34 }
 0x252   : > { %2744 = vset.pattern.permute.xlu1 %v2926_v55 }
 0x253   : > { %1077 = vperm.xlu1 %2744, %v1042_v37  }
 0x254   : > { %2750 = vset.pattern.permute.xlu0 %v2925_v61 }
 0x255   : > { %1166 = vperm.xlu0 %2750, %v1045_v30  }
 0x257   : > { %2746 = vset.pattern.permute.xlu1 %v2925_v61 }
 0x258   : > { %1157 = vperm.xlu1 %2746, %v1042_v37  }
 0x259   : > { %2751 = vset.pattern.permute.xlu0 %v2926_v55 }
 0x25a   : > { %1086 = vperm.xlu0 %2751, %v1045_v30  }
 0x25c   : > { %2747 = vset.pattern.permute.xlu1 %v2926_v55 }
 0x25d   : > { %1080 = vperm.xlu1 %2747, %v1043_v43  }
 0x25e   : > { %1095 = vperm.xlu0 %2751, %v1048_v31  }
 0x261   : > { %2748 = vset.pattern.permute.xlu1 %v2925_v61 }
 0x262   : > { %1160 = vperm.xlu1 %2748, %v1043_v43   ;;  %1098 = vperm.xlu0 %2751, %v1049_v32  }
 0x266   : > { %1163 = vperm.xlu1 %2748, %v1044_v28   ;;  %2756 = vset.pattern.permute.xlu0 %v2925_v61 }
 0x267   : > { %1178 = vperm.xlu0 %2756, %v1049_v32  }
 0x26a   : > { %2749 = vset.pattern.permute.xlu1 %v2926_v55 }
 0x26b   : > { %1089 = vperm.xlu1 %2749, %v1046_v41   ;;  %2759 = vset.pattern.permute.xlu0 %v2928_v17 }
 0x26f   : > { %2752 = vset.pattern.permute.xlu1 %v2925_v61 }
 0x270   : > { %1169 = vperm.xlu1 %2752, %v1046_v41  }
 0x274   : > { %2753 = vset.pattern.permute.xlu1 %v2926_v55 }
 0x275   : > { %1092 = vperm.xlu1 %2753, %v1047_v33  }
 0x279   : > { %2754 = vset.pattern.permute.xlu1 %v2925_v61 }
 0x27a   : > { %1172 = vperm.xlu1 %2754, %v1047_v33  }
 0x27e   : > { %1175 = vperm.xlu1 %2754, %v1048_v31  }
 0x282   : > { %2755 = vset.pattern.permute.xlu1 %v2926_v55 }
 0x283   : > { %1101 = vperm.xlu1 %2755, %v1050_v40  }
 0x287   : > { %2757 = vset.pattern.permute.xlu1 %v2925_v61 }
 0x288   : > { %1181 = vperm.xlu1 %2757, %v1050_v40  }
 0x28c   : > { %2758 = vset.pattern.permute.xlu1 %v2928_v17 }
 0x2b1   : > { %v1137_v50 = vpop.permute.xlu1 %1136  ;;  %v1057_v45 = vpop.permute.xlu0 %1056 }
 0x2b2   : > { %vm1183_vm1 = vcmp.eq.s32.totalorder %v1137_v50, %v3430_v36  ;;  %vm1103_vm2 = vcmp.eq.s32.totalorder %v1057_v45, %v3430_v36  ;;  %vm1184_vm3 = vcmp.eq.s32.totalorder %v1137_v50, %v3433_v3  ;;  %vm1104_vm4 = vcmp.eq.s32.totalorder %v1057_v45, %v3433_v3 }
 0x2b3   : > { %vm3439_vm5 = vmor %vm1103_vm2, %vm1183_vm1 }
 0x2b4   : > { %vm1216_vm10 = vmor %vm1104_vm4, %vm1184_vm3 }
 0x2b5   : > { %v1140_v44 = vpop.permute.xlu1 %1139  ;;  %v1060_v47 = vpop.permute.xlu0 %1059 }
 0x2b6   : > { %vm1185_vm6 = vcmp.eq.s32.totalorder %v1140_v44, %v3430_v36  ;;  %vm1186_vm7 = vcmp.eq.s32.totalorder %v1140_v44, %v3433_v3  ;;  %vm1105_vm8 = vcmp.eq.s32.totalorder %v1060_v47, %v3430_v36  ;;  %vm1106_vm9 = vcmp.eq.s32.totalorder %v1060_v47, %v3433_v3 }
 0x2b7   : > { %vm1217_vm11 = vmor %vm1105_vm8, %vm1185_vm6 }
 0x2b8   : > { %vm1218_vm12 = vmor %vm1106_vm9, %vm1186_vm7 }
 0x2b9   : > { %vm2206_vm13 = vmpackc.low %vm1218_vm12, %vm1216_vm10  ;;  %v1063_v5 = vpop.permute.xlu0 %1062 }
 0x2ba   : > { %2207 = vmatprep.mubr.msk.bf16.mxu0 %vm2206_vm13, %v2927_v6  ;;  %v1066_v7 = vpop.permute.xlu1 %1065  ;;  %vm2208_vm14 = vmpackc.low %vm1217_vm11, %vm3439_vm5  ;;  %vm1107_vm15 = vcmp.eq.s32.totalorder %v1063_v5, %v3430_v36  ;;  %vm1108_vm0 = vcmp.eq.s32.totalorder %v1063_v5, %v3433_v3 }
 0x2bb   : > { %2209 = vmatmul.mubr.msk.bf16.vlgmr.msra.gmra.mrb[0].mxu0 %vm2208_vm14, %v2927_v6  ;;  %vm1109_vm2 = vcmp.eq.s32.totalorder %v1066_v7, %v3430_v36  ;;  %vm1110_vm5 = vcmp.eq.s32.totalorder %v1066_v7, %v3433_v3 }
 0x2be   : > { %v1143_v49 = vpop.permute.xlu0 %1142 }
 0x2bf   : > { %v1146_v8 = vpop.permute.xlu1 %1145  ;;  %vm1187_vm1 = vcmp.eq.s32.totalorder %v1143_v49, %v3430_v36  ;;  %vm1188_vm6 = vcmp.eq.s32.totalorder %v1143_v49, %v3433_v3 }
 0x2c0   : > { %vm1189_vm3 = vcmp.eq.s32.totalorder %v1146_v8, %v3430_v36  ;;  %vm1190_vm4 = vcmp.eq.s32.totalorder %v1146_v8, %v3433_v3  ;;  %vm1219_vm7 = vmor %vm1107_vm15, %vm1187_vm1 }
 0x2c1   : > { %vm1221_vm8 = vmor %vm1109_vm2, %vm1189_vm3 }
 0x2c2   : > { %vm1222_vm9 = vmor %vm1110_vm5, %vm1190_vm4  ;;  %v1155_v48 = vpop.permute.xlu0 %1154 }
 0x2c3   : > { %vm1220_vm10 = vmor %vm1108_vm0, %vm1188_vm6 }
 0x2c4   : > { %vm2210_vm11 = vmpackc.low %vm1222_vm9, %vm1220_vm10  ;;  %v1069_v9 = vpop.permute.xlu1 %1068 }
 0x2c5   : > { %2211 = vmatprep.mubr.msk.bf16.mxu0 %vm2210_vm11, %v2927_v6  ;;  %vm2212_vm12 = vmpackc.low %vm1221_vm8, %vm1219_vm7  ;;  %vm1111_vm15 = vcmp.eq.s32.totalorder %v1069_v9, %v3430_v36  ;;  %vm1112_vm0 = vcmp.eq.s32.totalorder %v1069_v9, %v3433_v3  ;;  %vm1195_vm11 = vcmp.eq.s32.totalorder %v1155_v48, %v3430_v36 }
 0x2c6   : > { %2213 = vmatmul.mubr.msk.bf16.gmra.mrb[4].mxu0 %vm2212_vm12, %v2927_v6 }
 0x2c7   : > { %v1072_v11 = vpop.permute.xlu0 %1071 }
 0x2c8   : > { %vm1113_vm1 = vcmp.eq.s32.totalorder %v1072_v11, %v3430_v36  ;;  %vm1114_vm3 = vcmp.eq.s32.totalorder %v1072_v11, %v3433_v3 }
 0x2c9   : > { %v1149_v10 = vpop.permute.xlu1 %1148 }
 0x2ca   : > { %vm1191_vm13 = vcmp.eq.s32.totalorder %v1149_v10, %v3430_v36  ;;  %vm1192_vm14 = vcmp.eq.s32.totalorder %v1149_v10, %v3433_v3 }
 0x2cb   : > { %vm1223_vm2 = vmor %vm1111_vm15, %vm1191_vm13  ;;  %v1075_v53 = vpop.permute.xlu0 %1074  ;;  %vm1196_vm13 = vcmp.eq.s32.totalorder %v1155_v48, %v3433_v3 }
 0x2cc   : > { %vm1224_vm4 = vmor %vm1112_vm0, %vm1192_vm14  ;;  %vm1115_vm12 = vcmp.eq.s32.totalorder %v1075_v53, %v3430_v36  ;;  %vm1116_vm14 = vcmp.eq.s32.totalorder %v1075_v53, %v3433_v3 }
 0x2cd   : > { %v1152_v54 = vpop.permute.xlu1 %1151  ;;  %vm1227_vm15 = vmor %vm1115_vm12, %vm1195_vm11 }
 0x2ce   : > { %vm1193_vm6 = vcmp.eq.s32.totalorder %v1152_v54, %v3430_v36  ;;  %vm1194_vm7 = vcmp.eq.s32.totalorder %v1152_v54, %v3433_v3  ;;  %vm1228_vm0 = vmor %vm1116_vm14, %vm1196_vm13 }
 0x2cf   : > { %vm1225_vm5 = vmor %vm1113_vm1, %vm1193_vm6  ;;  %v1084_v38 = vpop.permute.xlu0 %1083 }
 0x2d0   : > { %vm1226_vm8 = vmor %vm1114_vm3, %vm1194_vm7  ;;  %vm1121_vm14 = vcmp.eq.s32.totalorder %v1084_v38, %v3430_v36 }
 0x2d1   : > { %vm2214_vm9 = vmpackc.low %vm1226_vm8, %vm1224_vm4 }
 0x2d2   : > { %2215 = vmatprep.mubr.msk.bf16.mxu0 %vm2214_vm9, %v2927_v6  ;;  %v1078_v51 = vpop.permute.xlu1 %1077  ;;  %vm2216_vm10 = vmpackc.low %vm1225_vm5, %vm1223_vm2 }
 0x2d3   : > { %2217 = vmatmul.mubr.msk.bf16.gmra.mrb[8].mxu0 %vm2216_vm10, %v2927_v6  ;;  %vm1117_vm1 = vcmp.eq.s32.totalorder %v1078_v51, %v3430_v36  ;;  %vm1118_vm2 = vcmp.eq.s32.totalorder %v1078_v51, %v3433_v3 }
 0x2d4   : > { %v1167_v57 = vpop.permute.xlu0 %1166 }
 0x2d7   : > { %v1158_v52 = vpop.permute.xlu1 %1157 }
 0x2d8   : > { %vm1197_vm3 = vcmp.eq.s32.totalorder %v1158_v52, %v3430_v36  ;;  %vm1198_vm4 = vcmp.eq.s32.totalorder %v1158_v52, %v3433_v3 }
 0x2d9   : > { %vm1229_vm6 = vmor %vm1117_vm1, %vm1197_vm3  ;;  %vm1122_vm3 = vcmp.eq.s32.totalorder %v1084_v38, %v3433_v3  ;;  %v1087_v56 = vpop.permute.xlu0 %1086 }
 0x2da   : > { %vm1230_vm7 = vmor %vm1118_vm2, %vm1198_vm4 }
 0x2db   : > { %vm2218_vm5 = vmpackc.low %vm1230_vm7, %vm1228_vm0 }
 0x2dc   : > { %2219 = vmatprep.mubr.msk.bf16.mxu0 %vm2218_vm5, %v2927_v6  ;;  %v1081_v12 = vpop.permute.xlu1 %1080  ;;  %vm2220_vm8 = vmpackc.low %vm1229_vm6, %vm1227_vm15  ;;  %vm1203_vm5 = vcmp.eq.s32.totalorder %v1167_v57, %v3430_v36 }
 0x2dd   : > { %2221 = vmatmul.mubr.msk.bf16.gmra.mrb[12].mxu0 %vm2220_vm8, %v2927_v6  ;;  %vm1119_vm11 = vcmp.eq.s32.totalorder %v1081_v12, %v3430_v36  ;;  %vm1120_vm12 = vcmp.eq.s32.totalorder %v1081_v12, %v3433_v3  ;;  %vm1123_vm8 = vcmp.eq.s32.totalorder %v1087_v56, %v3430_v36  ;;  %v1096_v60 = vpop.permute.xlu0 %1095 }
 0x2e1   : > { %v1161_v13 = vpop.permute.xlu1 %1160  ;;  %v1099_v55 = vpop.permute.xlu0 %1098 }
 0x2e2   : > { %vm1199_vm9 = vcmp.eq.s32.totalorder %v1161_v13, %v3430_v36  ;;  %vm1200_vm10 = vcmp.eq.s32.totalorder %v1161_v13, %v3433_v3 }
 0x2e3   : > { %vm1231_vm13 = vmor %vm1119_vm11, %vm1199_vm9  ;;  %vm1204_vm9 = vcmp.eq.s32.totalorder %v1167_v57, %v3433_v3 }
 0x2e4   : > { %vm1232_vm1 = vmor %vm1120_vm12, %vm1200_vm10  ;;  %vm1124_vm10 = vcmp.eq.s32.totalorder %v1087_v56, %v3433_v3 }
 0x2e5   : > { %v1164_v14 = vpop.permute.xlu1 %1163  ;;  %vm1235_vm11 = vmor %vm1123_vm8, %vm1203_vm5 }
 0x2e6   : > { %vm1201_vm15 = vcmp.eq.s32.totalorder %v1164_v14, %v3430_v36  ;;  %vm1202_vm0 = vcmp.eq.s32.totalorder %v1164_v14, %v3433_v3  ;;  %v1179_v27 = vpop.permute.xlu0 %1178 }
 0x2e7   : > { %vm1233_vm4 = vmor %vm1121_vm14, %vm1201_vm15 }
 0x2e8   : > { %vm1234_vm2 = vmor %vm1122_vm3, %vm1202_vm0 }
 0x2e9   : > { %vm2222_vm6 = vmpackc.low %vm1234_vm2, %vm1232_vm1 }
 0x2ea   : > { %2223 = vmatprep.mubr.msk.bf16.mxu0 %vm2222_vm6, %v2927_v6  ;;  %v1090_v21 = vpop.permute.xlu1 %1089  ;;  %vm2224_vm7 = vmpackc.low %vm1233_vm4, %vm1231_vm13 }
 0x2eb   : > { %2225 = vmatmul.mubr.msk.bf16.gmra.mrb[16].mxu0 %vm2224_vm7, %v2927_v6  ;;  %vm1125_vm12 = vcmp.eq.s32.totalorder %v1090_v21, %v3430_v36  ;;  %vm1236_vm14 = vmor %vm1124_vm10, %vm1204_vm9  ;;  %vm1126_vm15 = vcmp.eq.s32.totalorder %v1090_v21, %v3433_v3  ;;  %vm1129_vm10 = vcmp.eq.s32.totalorder %v1096_v60, %v3430_v36 }
 0x2ef   : > { %v1170_v15 = vpop.permute.xlu1 %1169 }
 0x2f0   : > { %vm1205_vm1 = vcmp.eq.s32.totalorder %v1170_v15, %v3430_v36  ;;  %vm1206_vm13 = vcmp.eq.s32.totalorder %v1170_v15, %v3433_v3 }
 0x2f1   : > { %vm1237_vm0 = vmor %vm1125_vm12, %vm1205_vm1  ;;  %vm1130_vm1 = vcmp.eq.s32.totalorder %v1096_v60, %v3433_v3 }
 0x2f2   : > { %vm1238_vm3 = vmor %vm1126_vm15, %vm1206_vm13 }
 0x2f3   : > { %vm2226_vm4 = vmpackc.low %vm1238_vm3, %vm1236_vm14 }
 0x2f4   : > { %2227 = vmatprep.mubr.msk.bf16.mxu0 %vm2226_vm4, %v2927_v6  ;;  %v1093_v58 = vpop.permute.xlu1 %1092  ;;  %vm2228_vm2 = vmpackc.low %vm1237_vm0, %vm1235_vm11  ;;  %vm1131_vm4 = vcmp.eq.s32.totalorder %v1099_v55, %v3430_v36 }
 0x2f5   : > { %2229 = vmatmul.mubr.msk.bf16.gmra.mrb[20].mxu0 %vm2228_vm2, %v2927_v6  ;;  %vm1127_vm5 = vcmp.eq.s32.totalorder %v1093_v58, %v3430_v36  ;;  %vm1128_vm8 = vcmp.eq.s32.totalorder %v1093_v58, %v3433_v3  ;;  %vm1211_vm2 = vcmp.eq.s32.totalorder %v1179_v27, %v3430_v36 }
 0x2f9   : > { %v1173_v61 = vpop.permute.xlu1 %1172 }
 0x2fa   : > { %vm1207_vm6 = vcmp.eq.s32.totalorder %v1173_v61, %v3430_v36  ;;  %vm1208_vm7 = vcmp.eq.s32.totalorder %v1173_v61, %v3433_v3 }
 0x2fb   : > { %vm1239_vm9 = vmor %vm1127_vm5, %vm1207_vm6  ;;  %vm1132_vm6 = vcmp.eq.s32.totalorder %v1099_v55, %v3433_v3 }
 0x2fc   : > { %vm1240_vm12 = vmor %vm1128_vm8, %vm1208_vm7  ;;  %vm1212_vm7 = vcmp.eq.s32.totalorder %v1179_v27, %v3433_v3 }
 0x2fd   : > { %v1176_v2 = vpop.permute.xlu1 %1175  ;;  %vm1243_vm5 = vmor %vm1131_vm4, %vm1211_vm2 }
 0x2fe   : > { %vm1209_vm11 = vcmp.eq.s32.totalorder %v1176_v2, %v3430_v36  ;;  %vm1210_vm14 = vcmp.eq.s32.totalorder %v1176_v2, %v3433_v3  ;;  %vm1244_vm8 = vmor %vm1132_vm6, %vm1212_vm7 }
 0x2ff   : > { %vm1241_vm13 = vmor %vm1129_vm10, %vm1209_vm11 }
 0x300   : > { %vm1242_vm15 = vmor %vm1130_vm1, %vm1210_vm14 }
 0x301   : > { %vm2230_vm0 = vmpackc.low %vm1242_vm15, %vm1240_vm12 }
 0x302   : > { %2231 = vmatprep.mubr.msk.bf16.mxu0 %vm2230_vm0, %v2927_v6  ;;  %v1102_v16 = vpop.permute.xlu1 %1101  ;;  %vm2232_vm3 = vmpackc.low %vm1241_vm13, %vm1239_vm9 }
 0x303   : > { %2233 = vmatmul.mubr.msk.bf16.gmra.mrb[24].mxu0 %vm2232_vm3, %v2927_v6  ;;  %vm1133_vm10 = vcmp.eq.s32.totalorder %v1102_v16, %v3430_v36  ;;  %vm1134_vm9 = vcmp.eq.s32.totalorder %v1102_v16, %v3433_v3 }
 0x307   : > { %v1182_v0 = vpop.permute.xlu1 %1181 }
 0x308   : > { %vm1213_vm12 = vcmp.eq.s32.totalorder %v1182_v0, %v3430_v36  ;;  %vm1214_vm11 = vcmp.eq.s32.totalorder %v1182_v0, %v3433_v3 }
 0x309   : > { %vm1245_vm14 = vmor %vm1133_vm10, %vm1213_vm12 }
 0x30a   : > { %vm1246_vm1 = vmor %vm1134_vm9, %vm1214_vm11 }
 0x30b   : > { %vm2234_vm13 = vmpackc.low %vm1246_vm1, %vm1244_vm8 }
 0x30c   : > { %2235 = vmatprep.mubr.msk.bf16.mxu0 %vm2234_vm13, %v2927_v6  ;;  %vm2236_vm15 = vmpackc.low %vm1245_vm14, %vm1243_vm5 }
 0x30d   : > { %2237 = vmatmul.mubr.msk.bf16.gmra.mrb[28].mxu0 %vm2236_vm15, %v2927_v6 }
 0x38e   : > { %v2342_v18 = vpop.f32.mrb[0].mxu0 }
 0x38f   : > { %v2343_v19 = vpop.f32.mrb[1].mxu0 }
 0x390   : > { %v3521_v62 = vadd.f32 %v2343_v19, %v2342_v18  ;;  %v2345_v59 = vpop.f32.mrb[2].mxu0 }
 0x391   : > { %v2346_v20 = vpop.f32.mrb[3].mxu0 }
 0x392   : > { %vm1517_vm0 = vcmp.ge.f32.partialorder %v3521_v62, 0.0  ;;  %v1533_v42 = vmul.f32 0.2, %v3521_v62  ;;  %v3525_v22 = vadd.f32 %v2346_v20, %v2345_v59 }
 0x394   : > { %v1549_v39 = vsel %vm1517_vm0, %v3521_v62, %v1533_v42  ;;  %vm1518_vm3 = vcmp.ge.f32.partialorder %v3525_v22, 0.0  ;;  %v1534_v23 = vmul.f32 0.2, %v3525_v22 }
 0x395   : > { %v1565_v24 = vsub.f32 0.0, %v1549_v39 }
 0x396   : > { %v1550_v1 = vsel %vm1518_vm3, %v3525_v22, %v1534_v23 }
 0x397   : > { %v1581_v63 = vmul.f32 1.442695, %v1565_v24  ;;  %v1566_v25 = vsub.f32 0.0, %v1550_v1 }
 0x399   : > { %2760 = vpow2.f32 %v1581_v63  ;;  %v1583_v26 = vmul.f32 1.442695, %v1566_v25  ;;  %v2348_v28 = vpop.f32.mrb[4].mxu0 }
 0x39a   : > { %v2349_v29 = vpop.f32.mrb[5].mxu0 }
 0x39b   : > { %2762 = vpow2.f32 %v1583_v26  ;;  %v3531_v46 = vadd.f32 %v2349_v29, %v2348_v28  ;;  %v2351_v37 = vpop.f32.mrb[6].mxu0 }
 0x39c   : > { %v2352_v34 = vpop.f32.mrb[7].mxu0 }
 0x39d   : > { %vm1519_vm4 = vcmp.ge.f32.partialorder %v3531_v46, 0.0  ;;  %v1535_v30 = vmul.f32 0.2, %v3531_v46  ;;  %v3535_v43 = vadd.f32 %v2352_v34, %v2351_v37 }
 0x39f   : > { %v1551_v31 = vsel %vm1519_vm4, %v3531_v46, %v1535_v30  ;;  %vm1520_vm2 = vcmp.ge.f32.partialorder %v3535_v43, 0.0  ;;  %v1536_v32 = vmul.f32 0.2, %v3535_v43 }
 0x3a0   : > { %v1567_v41 = vsub.f32 0.0, %v1551_v31 }
 0x3a1   : > { %v1552_v33 = vsel %vm1520_vm2, %v3535_v43, %v1536_v32 }
 0x3a2   : > { %v1585_v40 = vmul.f32 1.442695, %v1567_v41  ;;  %v1568_v3 = vsub.f32 0.0, %v1552_v33 }
 0x3a3   : > { %v2761_v50 = vpop.eup %2760 }
 0x3a4   : > { %2764 = vpow2.f32 %v1585_v40  ;;  %v1587_v45 = vmul.f32 1.442695, %v1568_v3  ;;  %1632 = vperm.xlu1 %2758, %v2761_v50  }
 0x3a5   : > { %v2763_v4 = vpop.eup %2762 }
 0x3a6   : > { %1637 = vperm.xlu0 %2759, %v2763_v4   ;;  %v2354_v44 = vpop.f32.mrb[8].mxu0  ;;  %2766 = vpow2.f32 %v1587_v45 }
 0x3a7   : > { %v2355_v47 = vpop.f32.mrb[9].mxu0 }
 0x3a8   : > { %v3541_v5 = vadd.f32 %v2355_v47, %v2354_v44  ;;  %v2357_v7 = vpop.f32.mrb[10].mxu0 }
 0x3a9   : > { %v2358_v49 = vpop.f32.mrb[11].mxu0 }
 0x3aa   : > { %vm1521_vm6 = vcmp.ge.f32.partialorder %v3541_v5, 0.0  ;;  %v1537_v8 = vmul.f32 0.2, %v3541_v5  ;;  %v3545_v48 = vadd.f32 %v2358_v49, %v2357_v7 }
 0x3ac   : > { %v1553_v9 = vsel %vm1521_vm6, %v3541_v5, %v1537_v8  ;;  %vm1522_vm7 = vcmp.ge.f32.partialorder %v3545_v48, 0.0  ;;  %v1538_v10 = vmul.f32 0.2, %v3545_v48 }
 0x3ad   : > { %v1569_v11 = vsub.f32 0.0, %v1553_v9 }
 0x3ae   : > { %v2765_v54 = vpop.eup %2764  ;;  %v1554_v53 = vsel %vm1522_vm7, %v3545_v48, %v1538_v10 }
 0x3af   : > { %v1589_v51 = vmul.f32 1.442695, %v1569_v11  ;;  %v1570_v52 = vsub.f32 0.0, %v1554_v53  ;;  %1642 = vperm.xlu1 %2758, %v2765_v54  }
 0x3b0   : > { %v2360_v12 = vpop.f32.mrb[12].mxu0  ;;  %v2767_v14 = vpop.eup %2766 }
 0x3b1   : > { %2768 = vpow2.f32 %v1589_v51  ;;  %v1591_v38 = vmul.f32 1.442695, %v1570_v52  ;;  %v2361_v13 = vpop.f32.mrb[13].mxu0 }
 0x3b2   : > { %v3551_v57 = vadd.f32 %v2361_v13, %v2360_v12  ;;  %v2363_v21 = vpop.f32.mrb[14].mxu0 }
 0x3b3   : > { %2770 = vpow2.f32 %v1591_v38  ;;  %1647 = vperm.xlu1 %2758, %v2767_v14   ;;  %v2364_v56 = vpop.f32.mrb[15].mxu0 }
 0x3b4   : > { %vm1523_vm5 = vcmp.ge.f32.partialorder %v3551_v57, 0.0  ;;  %v1539_v15 = vmul.f32 0.2, %v3551_v57  ;;  %v3555_v58 = vadd.f32 %v2364_v56, %v2363_v21 }
 0x3b6   : > { %v1555_v60 = vsel %vm1523_vm5, %v3551_v57, %v1539_v15  ;;  %vm1524_vm8 = vcmp.ge.f32.partialorder %v3555_v58, 0.0  ;;  %v1540_v61 = vmul.f32 0.2, %v3555_v58 }
 0x3b7   : > { %v1571_v55 = vsub.f32 0.0, %v1555_v60 }
 0x3b8   : > { %v1556_v2 = vsel %vm1524_vm8, %v3555_v58, %v1540_v61 }
 0x3b9   : > { %v1593_v27 = vmul.f32 1.442695, %v1571_v55  ;;  %v1572_v16 = vsub.f32 0.0, %v1556_v2 }
 0x3bb   : > { %v2769_v0 = vpop.eup %2768  ;;  %2772 = vpow2.f32 %v1593_v27  ;;  %v1595_v17 = vmul.f32 1.442695, %v1572_v16 }
 0x3bc   : > { %1652 = vperm.xlu0 %2759, %v2769_v0  }
 0x3bd   : > { %v2771_v18 = vpop.eup %2770  ;;  %2774 = vpow2.f32 %v1595_v17 }
 0x3be   : > { %1657 = vperm.xlu1 %2758, %v2771_v18   ;;  %v2366_v19 = vpop.f32.mrb[16].mxu0 }
 0x3bf   : > { %v2367_v59 = vpop.f32.mrb[17].mxu0 }
 0x3c0   : > { %v3561_v20 = vadd.f32 %v2367_v59, %v2366_v19  ;;  %v2369_v42 = vpop.f32.mrb[18].mxu0 }
 0x3c1   : > { %v2370_v39 = vpop.f32.mrb[19].mxu0 }
 0x3c2   : > { %vm1525_vm10 = vcmp.ge.f32.partialorder %v3561_v20, 0.0  ;;  %v1541_v23 = vmul.f32 0.2, %v3561_v20  ;;  %v3565_v24 = vadd.f32 %v2370_v39, %v2369_v42 }
 0x3c4   : > { %v1557_v1 = vsel %vm1525_vm10, %v3561_v20, %v1541_v23  ;;  %vm1526_vm12 = vcmp.ge.f32.partialorder %v3565_v24, 0.0  ;;  %v1542_v63 = vmul.f32 0.2, %v3565_v24 }
 0x3c5   : > { %v2773_v25 = vpop.eup %2772  ;;  %v1573_v26 = vsub.f32 0.0, %v1557_v1 }
 0x3c6   : > { %v1558_v28 = vsel %vm1526_vm12, %v3565_v24, %v1542_v63  ;;  %1662 = vperm.xlu0 %2759, %v2773_v25  }
 0x3c7   : > { %v2775_v29 = vpop.eup %2774  ;;  %v1597_v37 = vmul.f32 1.442695, %v1573_v26  ;;  %v1574_v34 = vsub.f32 0.0, %v1558_v28 }
 0x3c8   : > { %1667 = vperm.xlu1 %2758, %v2775_v29   ;;  %v2372_v30 = vpop.f32.mrb[20].mxu0 }
 0x3c9   : > { %2776 = vpow2.f32 %v1597_v37  ;;  %v1599_v31 = vmul.f32 1.442695, %v1574_v34  ;;  %v2373_v32 = vpop.f32.mrb[21].mxu0 }
 0x3ca   : > { %v3571_v41 = vadd.f32 %v2373_v32, %v2372_v30  ;;  %v2375_v33 = vpop.f32.mrb[22].mxu0  ;;  %v1328_v30 = vshrl.u32 %v1052_v35, 7 }
 0x3cb   : > { %2778 = vpow2.f32 %v1599_v31  ;;  %v2376_v40 = vpop.f32.mrb[23].mxu0  ;;  %v2189_v31 = vld [vmem:[%s311_s18] ss:$0 sm:$0xff] }
 0x3cc   : > { %vm1527_vm11 = vcmp.ge.f32.partialorder %v3571_v41, 0.0  ;;  %v1543_v3 = vmul.f32 0.2, %v3571_v41  ;;  %v3575_v50 = vadd.f32 %v2376_v40, %v2375_v33  ;;  %v1329_v32 = vadd.s32 8, %v1328_v30 }
 0x3cd   : > { %v1330_v33 = vadd.s32 16, %v1328_v30  ;;  %v1331_v40 = vadd.s32 24, %v1328_v30  ;;  %vm1348_vm0 = vcmp.eq.s32.totalorder %v1328_v30, %v2189_v31  ;;  %v1334_v35 = vadd.s32 48, %v1328_v30 }
 0x3ce   : > { %v1559_v45 = vsel %vm1527_vm11, %v3571_v41, %v1543_v3  ;;  %vm1528_vm9 = vcmp.ge.f32.partialorder %v3575_v50, 0.0  ;;  %v1544_v4 = vmul.f32 0.2, %v3575_v50  ;;  %vm1349_vm3 = vcmp.eq.s32.totalorder %v1329_v32, %v2189_v31 }
 0x3cf   : > { %v1575_v44 = vsub.f32 0.0, %v1559_v45  ;;  %vm1350_vm4 = vcmp.eq.s32.totalorder %v1330_v33, %v2189_v31  ;;  %vm1351_vm2 = vcmp.eq.s32.totalorder %v1331_v40, %v2189_v31  ;;  %vm2238_vm6 = vmpackc.low %vm1349_vm3, %vm1348_vm0  ;;  %v1332_v3 = vadd.s32 32, %v1328_v30 }
 0x3d0   : > { %v1560_v47 = vsel %vm1528_vm9, %v3575_v50, %v1544_v4  ;;  %v1333_v45 = vadd.s32 40, %v1328_v30  ;;  %2534 = vmatprep.mubr.msk.bf16.mxu1 %vm2238_vm6, %v2927_v6  ;;  %vm3608_vm7 = vmpackc.low %vm1351_vm2, %vm1350_vm4  ;;  %vm1354_vm12 = vcmp.eq.s32.totalorder %v1334_v35, %v2189_v31  ;;  %v1737_v4 = vld [vmem:[%s3068_s19 + $0x18] sm:$0xff] }
 0x3d1   : > { %v1601_v7 = vmul.f32 1.442695, %v1575_v44  ;;  %v1576_v49 = vsub.f32 0.0, %v1560_v47  ;;  %v1335_v44 = vadd.s32 56, %v1328_v30  ;;  %vm1352_vm5 = vcmp.eq.s32.totalorder %v1332_v3, %v2189_v31 }
 0x3d2   : > { %vm1353_vm8 = vcmp.eq.s32.totalorder %v1333_v45, %v2189_v31 }
 0x3d3   : > { %v2777_v8 = vpop.eup %2776  ;;  %2780 = vpow2.f32 %v1601_v7  ;;  %v1603_v9 = vmul.f32 1.442695, %v1576_v49  ;;  %vm3612_vm10 = vmpackc.low %vm1353_vm8, %vm1352_vm5  ;;  %vm1355_vm11 = vcmp.eq.s32.totalorder %v1335_v44, %v2189_v31  ;;  %v1336_v49 = vadd.s32 64, %v1328_v30 }
 0x3d4   : > { %1672 = vperm.xlu0 %2759, %v2777_v8   ;;  %vm3616_vm9 = vmpackc.low %vm1355_vm11, %vm1354_vm12  ;;  %v1337_v8 = vadd.s32 72, %v1328_v30  ;;  %vm1613_vm11 = vcmp.eq.s32.totalorder %v3430_v36, 32  ;;  %v1736_v36 = vld [vmem:[%s3068_s19 + $0x10] sm:$0xff] }
 0x3d5   : > { %v2779_v10 = vpop.eup %2778  ;;  %2782 = vpow2.f32 %v1603_v9  ;;  %v1338_v9 = vadd.s32 80, %v1328_v30  ;;  %v1623_v32 = vsel %vm1613_vm11, 1.0, %v3565_v24  ;;  %v1624_v45 = vsel %vm1613_vm11, 1.0, %v3571_v41 }
 0x3d6   : > { %1677 = vperm.xlu1 %2758, %v2779_v10   ;;  %v2378_v11 = vpop.f32.mrb[24].mxu0  ;;  %v1339_v10 = vadd.s32 88, %v1328_v30  ;;  %v1625_v35 = vsel %vm1613_vm11, 1.0, %v3575_v50 }
 0x3d7   : > { %v2379_v54 = vpop.f32.mrb[25].mxu0 }
 0x3d8   : > { %v3581_v53 = vadd.f32 %v2379_v54, %v2378_v11  ;;  %v2381_v51 = vpop.f32.mrb[26].mxu0  ;;  %vm1359_vm0 = vcmp.eq.s32.totalorder %v1339_v10, %v2189_v31  ;;  %v1735_v11 = vld [vmem:[%s3068_s19 + $0x8] sm:$0xff] }
 0x3d9   : > { %v2382_v52 = vpop.f32.mrb[27].mxu0 }
 0x3da   : > { %vm1529_vm14 = vcmp.ge.f32.partialorder %v3581_v53, 0.0  ;;  %v1545_v12 = vmul.f32 0.2, %v3581_v53  ;;  %v3585_v38 = vadd.f32 %v2382_v52, %v2381_v51  ;;  %v1340_v51 = vadd.s32 96, %v1328_v30 }
 0x3db   : > { %v1341_v52 = vadd.s32 104, %v1328_v30 }
 0x3dc   : > { %v1561_v13 = vsel %vm1529_vm14, %v3581_v53, %v1545_v12  ;;  %vm1530_vm1 = vcmp.ge.f32.partialorder %v3585_v38, 0.0  ;;  %v1546_v14 = vmul.f32 0.2, %v3585_v38  ;;  %vm1356_vm14 = vcmp.eq.s32.totalorder %v1336_v49, %v2189_v31 }
 0x3dd   : > { %v2781_v21 = vpop.eup %2780  ;;  %v1577_v56 = vsub.f32 0.0, %v1561_v13  ;;  %v1342_v12 = vadd.s32 112, %v1328_v30  ;;  %v1343_v13 = vadd.s32 120, %v1328_v30  ;;  %vm1360_vm4 = vcmp.eq.s32.totalorder %v1340_v51, %v2189_v31 }
 0x3de   : > { %v1562_v15 = vsel %vm1530_vm1, %v3585_v38, %v1546_v14  ;;  %1682 = vperm.xlu0 %2759, %v2781_v21   ;;  %vm1357_vm1 = vcmp.eq.s32.totalorder %v1337_v8, %v2189_v31  ;;  %vm1361_vm2 = vcmp.eq.s32.totalorder %v1341_v52, %v2189_v31  ;;  %v1627_v10 = vsel %vm1613_vm11, 1.0, %v3585_v38 }
 0x3df   : > { %v2783_v60 = vpop.eup %2782  ;;  %v1605_v61 = vmul.f32 1.442695, %v1577_v56  ;;  %v1578_v55 = vsub.f32 0.0, %v1562_v15  ;;  %vm3628_vm6 = vmpackc.low %vm1361_vm2, %vm1360_vm4  ;;  %vm1362_vm5 = vcmp.eq.s32.totalorder %v1342_v12, %v2189_v31  ;;  %vm1363_vm8 = vcmp.eq.s32.totalorder %v1343_v13, %v2189_v31 }
 0x3e0   : > { %1687 = vperm.xlu1 %2758, %v2783_v60   ;;  %v2384_v2 = vpop.f32.mrb[28].mxu0  ;;  %vm3632_vm12 = vmpackc.low %vm1363_vm8, %vm1362_vm5  ;;  %v1614_v15 = vsel %vm1613_vm11, 1.0, %v3521_v62  ;;  %v1615_v60 = vsel %vm1613_vm11, 1.0, %v3525_v22 }
 0x3e1   : > { %2784 = vpow2.f32 %v1605_v61  ;;  %v1607_v27 = vmul.f32 1.442695, %v1578_v55  ;;  %v2385_v16 = vpop.f32.mrb[29].mxu0 }
 0x3e2   : > { %v3591_v0 = vadd.f32 %v2385_v16, %v2384_v2  ;;  %v2387_v17 = vpop.f32.mrb[30].mxu0 }
 0x3e3   : > { %2786 = vpow2.f32 %v1607_v27  ;;  %v2388_v18 = vpop.f32.mrb[31].mxu0 }
 0x3e4   : > { %vm1531_vm13 = vcmp.ge.f32.partialorder %v3591_v0, 0.0  ;;  %v1547_v19 = vmul.f32 0.2, %v3591_v0  ;;  %v3595_v59 = vadd.f32 %v2388_v18, %v2387_v17  ;;  %v1616_v17 = vsel %vm1613_vm11, 1.0, %v3531_v46 }
 0x3e5   : > { %v1617_v18 = vsel %vm1613_vm11, 1.0, %v3535_v43  ;;  %v1628_v13 = vsel %vm1613_vm11, 1.0, %v3591_v0 }
 0x3e6   : > { %v1563_v42 = vsel %vm1531_vm13, %v3591_v0, %v1547_v19  ;;  %vm1532_vm15 = vcmp.ge.f32.partialorder %v3595_v59, 0.0  ;;  %v1548_v39 = vmul.f32 0.2, %v3595_v59  ;;  %vm3620_vm13 = vmpackc.low %vm1357_vm1, %vm1356_vm14  ;;  %v1734_v0 = vld [vmem:[%s3068_s19] sm:$0xff] }
 0x3e7   : > { %v1579_v23 = vsub.f32 0.0, %v1563_v42 }
 0x3e8   : > { %v1564_v1 = vsel %vm1532_vm15, %v3595_v59, %v1548_v39  ;;  %vm1358_vm15 = vcmp.eq.s32.totalorder %v1338_v9, %v2189_v31  ;;  %v1622_v31 = vsel %vm1613_vm11, 1.0, %v3561_v20  ;;  %v1626_v9 = vsel %vm1613_vm11, 1.0, %v3581_v53 }
 0x3e9   : > { %v1609_v63 = vmul.f32 1.442695, %v1579_v23  ;;  %v1580_v25 = vsub.f32 0.0, %v1564_v1  ;;  %vm3624_vm3 = vmpackc.low %vm1359_vm0, %vm1358_vm15  ;;  %v1618_v23 = vsel %vm1613_vm11, 1.0, %v3541_v5  ;;  %v1619_v1 = vsel %vm1613_vm11, 1.0, %v3545_v48 }
 0x3ea   : > { %v1629_v53 = vsel %vm1613_vm11, 1.0, %v3595_v59 }
 0x3eb   : > { %v2785_v26 = vpop.eup %2784  ;;  %2788 = vpow2.f32 %v1609_v63  ;;  %v1611_v28 = vmul.f32 1.442695, %v1580_v25 }
 0x3ec   : > { %1692 = vperm.xlu0 %2759, %v2785_v26  }
 0x3ed   : > { %v2787_v29 = vpop.eup %2786  ;;  %2790 = vpow2.f32 %v1611_v28  ;;  %v1620_v28 = vsel %vm1613_vm11, 1.0, %v3551_v57 }
 0x3ee   : > { %1697 = vperm.xlu1 %2758, %v2787_v29   ;;  %v1621_v29 = vsel %vm1613_vm11, 1.0, %v3555_v58 }
 0x3f5   : > { %v2789_v37 = vpop.eup %2788 }
 0x3f6   : > { %1702 = vperm.xlu0 %2759, %v2789_v37  }
 0x3f7   : > { %v2791_v34 = vpop.eup %2790 }
 0x3f8   : > { %1707 = vperm.xlu1 %2758, %v2791_v34  }
 0x423   : > { %v1633_v56 = vpop.permute.xlu1 %1632 }
 0x424   : > { %v1710_v55 = vmul.f32 %v1633_v56, %v1614_v15 }
 0x425   : > { %v1638_v61 = vpop.permute.xlu0 %1637 }
 0x426   : > { %v1711_v2 = vmul.f32 %v1638_v61, %v1615_v60 }
 0x428   : > { %v1726_v27 = vpack.c.bf16 %v1711_v2, %v1710_v55  ;;  %v1740_v55 = vld [vmem:[%s3068_s19 + $0x30] sm:$0xff]  ;;  %v1738_v2 = vld [vmem:[%s3068_s19 + $0x20] sm:$0xff] }
 0x42a   : > { %2518 = vmatprep.subr.bf16.mxu1 %v1726_v27 }
 0x42b   : > { %2519 = vmatpush3.bf16.msra.mxu1 %v1726_v27 }
 0x42e   : > { %v1643_v16 = vpop.permute.xlu1 %1642 }
 0x42f   : > { %v1712_v19 = vmul.f32 %v1643_v16, %v1616_v17  ;;  %v1741_v16 = vld [vmem:[%s3068_s19 + $0x38] sm:$0xff] }
 0x432   : > { %v1648_v62 = vpop.permute.xlu1 %1647 }
 0x433   : > { %v1713_v42 = vmul.f32 %v1648_v62, %v1617_v18  ;;  %v1739_v62 = vld [vmem:[%s3068_s19 + $0x28] sm:$0xff] }
 0x435   : > { %v1727_v39 = vpack.c.bf16 %v1713_v42, %v1712_v19 }
 0x437   : > { %2520 = vmatprep.subr.bf16.mxu1 %v1727_v39 }
 0x438   : > { %2521 = vmatpush3.bf16.msra.mxu1 %v1727_v39 }
 0x43b   : > { %v1653_v22 = vpop.permute.xlu0 %1652 }
 0x43c   : > { %v1714_v63 = vmul.f32 %v1653_v22, %v1618_v23 }
 0x43d   : > { %v1658_v46 = vpop.permute.xlu1 %1657 }
 0x43e   : > { %v1715_v25 = vmul.f32 %v1658_v46, %v1619_v1  ;;  %v1744_v1 = vld [vmem:[%s3068_s19 + $0x50] sm:$0xff]  ;;  %v1742_v46 = vld [vmem:[%s3068_s19 + $0x40] sm:$0xff] }
 0x440   : > { %v1728_v26 = vpack.c.bf16 %v1715_v25, %v1714_v63  ;;  %v1745_v25 = vld [vmem:[%s3068_s19 + $0x58] sm:$0xff] }
 0x442   : > { %2522 = vmatprep.subr.bf16.mxu1 %v1728_v26 }
 0x443   : > { %2523 = vmatpush3.bf16.msra.mxu1 %v1728_v26 }
 0x445   : > { %v1663_v43 = vpop.permute.xlu0 %1662 }
 0x446   : > { %v1716_v37 = vmul.f32 %v1663_v43, %v1620_v28  ;;  %v1743_v28 = vld [vmem:[%s3068_s19 + $0x48] sm:$0xff] }
 0x447   : > { %v1668_v5 = vpop.permute.xlu1 %1667 }
 0x448   : > { %v1717_v34 = vmul.f32 %v1668_v5, %v1621_v29 }
 0x44a   : > { %v1729_v30 = vpack.c.bf16 %v1717_v34, %v1716_v37 }
 0x44c   : > { %2524 = vmatprep.subr.bf16.mxu1 %v1729_v30 }
 0x44d   : > { %2525 = vmatpush3.bf16.msra.mxu1 %v1729_v30 }
 0x453   : > { %v1673_v48 = vpop.permute.xlu0 %1672 }
 0x454   : > { %v1718_v33 = vmul.f32 %v1673_v48, %v1622_v31  ;;  %v1748_v48 = vld [vmem:[%s3068_s19 + $0x70] sm:$0xff]  ;;  %v1746_v31 = vld [vmem:[%s3068_s19 + $0x60] sm:$0xff] }
 0x455   : > { %v1678_v57 = vpop.permute.xlu1 %1677 }
 0x456   : > { %v1719_v40 = vmul.f32 %v1678_v57, %v1623_v32  ;;  %v1749_v57 = vld [vmem:[%s3068_s19 + $0x78] sm:$0xff] }
 0x458   : > { %v1730_v3 = vpack.c.bf16 %v1719_v40, %v1718_v33 }
 0x45a   : > { %2526 = vmatprep.subr.bf16.mxu1 %v1730_v3 }
 0x45b   : > { %2527 = vmatpush3.bf16.msra.mxu1 %v1730_v3  ;;  %v1747_v3 = vld [vmem:[%s3068_s19 + $0x68] sm:$0xff] }
 0x45d   : > { %v1683_v58 = vpop.permute.xlu0 %1682 }
 0x45e   : > { %v1720_v44 = vmul.f32 %v1683_v58, %v1624_v45 }
 0x45f   : > { %v1688_v20 = vpop.permute.xlu1 %1687 }
 0x460   : > { %v1721_v49 = vmul.f32 %v1688_v20, %v1625_v35 }
 0x462   : > { %v1731_v8 = vpack.c.bf16 %v1721_v49, %v1720_v44 }
 0x464   : > { %2528 = vmatprep.subr.bf16.mxu1 %v1731_v8 }
 0x465   : > { %2529 = vmatpush3.bf16.msra.mxu1 %v1731_v8 }
 0x46b   : > { %v1693_v24 = vpop.permute.xlu0 %1692 }
 0x46c   : > { %v1722_v51 = vmul.f32 %v1693_v24, %v1626_v9  ;;  %v2929_v9 = vmov (!%p2254_p2), 32  }
 0x46d   : > { %v1698_v41 = vpop.permute.xlu1 %1697  ;;  %2793 = vset.pattern.permute.xlu1 (!%p2254_p2), %v2929_v9  ;;  %2792 = vset.pattern.permute.xlu0 (!%p2254_p2), %v2929_v9 }
 0x46e   : > { %v1723_v52 = vmul.f32 %v1698_v41, %v1627_v10 }
 0x470   : > { %v1732_v12 = vpack.c.bf16 %v1723_v52, %v1722_v51 }
 0x472   : > { %2530 = vmatprep.subr.bf16.mxu1 %v1732_v12 }
 0x473   : > { %2531 = vmatpush3.bf16.msra.mxu1 %v1732_v12 }
 0x475   : > { %v1703_v50 = vpop.permute.xlu0 %1702 }
 0x476   : > { %v1724_v38 = vmul.f32 %v1703_v50, %v1628_v13 }
 0x477   : > { %v1708_v56 = vpop.permute.xlu1 %1707 }
 0x478   : > { %v1725_v15 = vmul.f32 %v1708_v56, %v1629_v53 }
 0x47a   : > { %v1733_v60 = vpack.c.bf16 %v1725_v15, %v1724_v38 }
 0x47c   : > { %2532 = vmatprep.subr.bf16.mxu1 %v1733_v60 }
 0x47d   : > { %2533 = vmatpush3.bf16.msra.mxu1 %v1733_v60 }
 0x480   : > { %2535 = vmatmul.mubr.msk.bf16.vlgmr.msra.gmra.mrb[0].mxu1 %vm3608_vm7, %v2927_v6 }
 0x481   : > { %2538 = vmatprep.mubr.msk.bf16.mxu1 %vm3612_vm10, %v2927_v6 }
 0x488   : > { %2539 = vmatmul.mubr.msk.bf16.gmra.mrb[4].mxu1 %vm3616_vm9, %v2927_v6 }
 0x489   : > { %2542 = vmatprep.mubr.msk.bf16.mxu1 %vm3620_vm13, %v2927_v6 }
 0x490   : > { %2543 = vmatmul.mubr.msk.bf16.gmra.mrb[8].mxu1 %vm3624_vm3, %v2927_v6 }
 0x491   : > { %2546 = vmatprep.mubr.msk.bf16.mxu1 %vm3628_vm6, %v2927_v6 }
 0x498   : > { %2547 = vmatmul.mubr.msk.bf16.gmra.mrb[12].mxu1 %vm3632_vm12, %v2927_v6 }
 0x553   : > { %v2536_v59 = vpop.f32.mrb[0].mxu1 }
 0x554   : > { %v1849_v47 = vadd.f32 %v2536_v59, %v1736_v36  ;;  %v1784_v7 = vpop.f32.mrb[1].mxu1 }
 0x555   : > { %v1847_v54 = vadd.f32 %v1784_v7, %v1734_v0  ;;  %v2537_v14 = vpop.f32.mrb[2].mxu1 }
 0x556   : > { %1865 = vst [vmem:[%s3068_s19 + $0x10] sm:$0xff] %v1849_v47  ;;  %v1850_v61 = vadd.f32 %v2537_v14, %v1737_v4  ;;  %v1787_v21 = vpop.f32.mrb[3].mxu1 }
 0x557   : > { %1863 = vst [vmem:[%s3068_s19] sm:$0xff] %v1847_v54  ;;  %v1848_v6 = vadd.f32 %v1787_v21, %v1735_v11 }
 0x558   : > { %1866 = vst [vmem:[%s3068_s19 + $0x18] sm:$0xff] %v1850_v61 }
 0x559   : > { %1864 = vst [vmem:[%s3068_s19 + $0x8] sm:$0xff] %v1848_v6 }
 0x55b   : > { %v2540_v27 = vpop.f32.mrb[4].mxu1 }
 0x55c   : > { %v1853_v17 = vadd.f32 %v2540_v27, %v1740_v55  ;;  %v1800_v18 = vpop.f32.mrb[5].mxu1 }
 0x55d   : > { %v1851_v19 = vadd.f32 %v1800_v18, %v1738_v2  ;;  %v2541_v42 = vpop.f32.mrb[6].mxu1  ;;  %v3740_v49 = vld [vmem:[%s3068_s19 + $0x10] sm:$0xff] (!%p2254_p2) }
 0x55e   : > { %1869 = vst [vmem:[%s3068_s19 + $0x30] sm:$0xff] %v1853_v17  ;;  %v1854_v39 = vadd.f32 %v2541_v42, %v1741_v16  ;;  %v1803_v22 = vpop.f32.mrb[7].mxu1  ;;  %v3743_v8 = vld [vmem:[%s3068_s19] sm:$0xff] (!%p2254_p2)  ;;  %2794 = vrcp.f32 (!%p2254_p2), %v3740_v49 }
 0x55f   : > { %1867 = vst [vmem:[%s3068_s19 + $0x20] sm:$0xff] %v1851_v19  ;;  %v1852_v23 = vadd.f32 %v1803_v22, %v1739_v62  ;;  %v3746_v24 = vld [vmem:[%s3068_s19 + $0x18] sm:$0xff] (!%p2254_p2)  ;;  %2796 = vrcp.f32 (!%p2254_p2), %v3743_v8 }
 0x560   : > { %1870 = vst [vmem:[%s3068_s19 + $0x38] sm:$0xff] %v1854_v39  ;;  %v3750_v10 = vld [vmem:[%s3068_s19 + $0x8] sm:$0xff] (!%p2254_p2)  ;;  %2798 = vrcp.f32 (!%p2254_p2), %v3746_v24 }
 0x561   : > { %1868 = vst [vmem:[%s3068_s19 + $0x28] sm:$0xff] %v1852_v23  ;;  %2800 = vrcp.f32 (!%p2254_p2), %v3750_v10 }
 0x563   : > { %v2544_v63 = vpop.f32.mrb[8].mxu1 }
 0x564   : > { %v1857_v26 = vadd.f32 %v2544_v63, %v1744_v1  ;;  %v1816_v43 = vpop.f32.mrb[9].mxu1 }
 0x565   : > { %v1855_v29 = vadd.f32 %v1816_v43, %v1742_v46  ;;  %v2545_v5 = vpop.f32.mrb[10].mxu1  ;;  %v3767_v12 = vld [vmem:[%s3068_s19 + $0x30] sm:$0xff] (!%p2254_p2) }
 0x566   : > { %1873 = vst [vmem:[%s3068_s19 + $0x50] sm:$0xff] %v1857_v26  ;;  %v1858_v37 = vadd.f32 %v2545_v5, %v1745_v25  ;;  %v1819_v34 = vpop.f32.mrb[11].mxu1  ;;  %v3759_v51 = vld [vmem:[%s3068_s19 + $0x20] sm:$0xff] (!%p2254_p2) }
 0x567   : > { %1871 = vst [vmem:[%s3068_s19 + $0x40] sm:$0xff] %v1855_v29  ;;  %v1856_v30 = vadd.f32 %v1819_v34, %v1743_v28  ;;  %v3764_v52 = vld [vmem:[%s3068_s19 + $0x38] sm:$0xff] (!%p2254_p2) }
 0x568   : > { %1874 = vst [vmem:[%s3068_s19 + $0x58] sm:$0xff] %v1858_v37  ;;  %v3756_v41 = vld [vmem:[%s3068_s19 + $0x28] sm:$0xff] (!%p2254_p2)  ;;  %v2795_v50 = vpop.eup (!%p2254_p2), %2794 }
 0x569   : > { %1872 = vst [vmem:[%s3068_s19 + $0x48] sm:$0xff] %v1856_v30  ;;  %2802 = vrcp.f32 (!%p2254_p2), %v3756_v41  ;;  %v2797_v13 = vpop.eup (!%p2254_p2), %2796  ;;  %1927 = vperm.xlu1 (!%p2254_p2), %2793, %v2795_v50  }
 0x56a   : > { %2804 = vrcp.f32 (!%p2254_p2), %v3759_v51  ;;  %v2799_v56 = vpop.eup (!%p2254_p2), %2798  ;;  %1917 = vperm.xlu0 (!%p2254_p2), %2792, %v2797_v13  }
 0x56b   : > { %v2548_v32 = vpop.f32.mrb[12].mxu1  ;;  %1882 = sbr.rel (%p2254_p2) target bundleno = 1548 (0x60c), region = 52  ;;  %2806 = vrcp.f32 (!%p2254_p2), %v3764_v52  ;;  %v2801_v15 = vpop.eup (!%p2254_p2), %2800 }
 0x56c   : > { %v1861_v33 = vadd.f32 %v2548_v32, %v1748_v48  ;;  %v1832_v40 = vpop.f32.mrb[13].mxu1  ;;  %2808 = vrcp.f32 (!%p2254_p2), %v3767_v12 }
 0x56d   : > { %v1859_v58 = vadd.f32 %v1832_v40, %v1746_v31  ;;  %v2549_v45 = vpop.f32.mrb[14].mxu1  ;;  %1932 = vperm.xlu1 (!%p2254_p2), %2793, %v2799_v56   ;;  %v3783_v0 = vld [vmem:[%s3068_s19 + $0x50] sm:$0xff] (!%p2254_p2) }
 0x56e   : > { %1877 = vst [vmem:[%s3068_s19 + $0x70] sm:$0xff] %v1861_v33  ;;  %v1862_v35 = vadd.f32 %v2549_v45, %v1749_v57  ;;  %v1835_v20 = vpop.f32.mrb[15].mxu1  ;;  %v3775_v38 = vld [vmem:[%s3068_s19 + $0x40] sm:$0xff] (!%p2254_p2)  ;;  %1922 = vperm.xlu0 (!%p2254_p2), %2792, %v2801_v15  }
 0x56f   : > { %1875 = vst [vmem:[%s3068_s19 + $0x60] sm:$0xff] %v1859_v58  ;;  %v1860_v44 = vadd.f32 %v1835_v20, %v1747_v3  ;;  %v3780_v60 = vld [vmem:[%s3068_s19 + $0x58] sm:$0xff] (!%p2254_p2) }
 0x570   : > { %1878 = vst [vmem:[%s3068_s19 + $0x78] sm:$0xff] %v1862_v35  ;;  %v3772_v53 = vld [vmem:[%s3068_s19 + $0x48] sm:$0xff] (!%p2254_p2) }
 0x571   : > { %1876 = vst [vmem:[%s3068_s19 + $0x68] sm:$0xff] %v1860_v44  ;;  %2810 = vrcp.f32 (!%p2254_p2), %v3772_v53 }
 0x572   : > { %2812 = vrcp.f32 %v3775_v38 }
 0x573   : > { %v2803_v36 = vpop.eup %2802  ;;  %2814 = vrcp.f32 %v3780_v60 }
 0x574   : > { %v2805_v59 = vpop.eup %2804  ;;  %1942 = vperm.xlu1 %2793, %v2803_v36   ;;  %2816 = vrcp.f32 %v3783_v0 }
 0x575   : > { %v2807_v47 = vpop.eup %2806  ;;  %1937 = vperm.xlu0 %2792, %v2805_v59   ;;  %v3799_v61 = vld [vmem:[%s3068_s19 + $0x70] sm:$0xff] }
 0x576   : > { %v3791_v7 = vld [vmem:[%s3068_s19 + $0x60] sm:$0xff]  ;;  %v2809_v11 = vpop.eup %2808 }
 0x577   : > { %v3796_v54 = vld [vmem:[%s3068_s19 + $0x78] sm:$0xff] }
 0x578   : > { %v3788_v4 = vld [vmem:[%s3068_s19 + $0x68] sm:$0xff]  ;;  %1952 = vperm.xlu1 %2793, %v2807_v47  }
 0x579   : > { %2818 = vrcp.f32 %v3788_v4  ;;  %1947 = vperm.xlu0 %2792, %v2809_v11  }
 0x57a   : > { %2820 = vrcp.f32 %v3791_v7 }
 0x57b   : > { %v2811_v14 = vpop.eup %2810  ;;  %2822 = vrcp.f32 %v3796_v54 }
 0x57c   : > { %v2813_v21 = vpop.eup %2812  ;;  %1962 = vperm.xlu1 %2793, %v2811_v14   ;;  %2824 = vrcp.f32 %v3799_v61 }
 0x57d   : > { %v2815_v6 = vpop.eup %2814  ;;  %1957 = vperm.xlu0 %2792, %v2813_v21  }
 0x57e   : > { %v2817_v55 = vpop.eup %2816 }
 0x580   : > { %1972 = vperm.xlu1 %2793, %v2815_v6  }
 0x581   : > { %1967 = vperm.xlu0 %2792, %v2817_v55  }
 0x583   : > { %v2819_v2 = vpop.eup %2818 }
 0x584   : > { %v2821_v27 = vpop.eup %2820  ;;  %1982 = vperm.xlu1 %2793, %v2819_v2  }
 0x585   : > { %v2823_v16 = vpop.eup %2822  ;;  %1977 = vperm.xlu0 %2792, %v2821_v27  }
 0x586   : > { %v2825_v17 = vpop.eup %2824 }
 0x588   : > { %1992 = vperm.xlu1 %2793, %v2823_v16  }
 0x589   : > { %1987 = vperm.xlu0 %2792, %v2825_v17  }
 0x5e8   : > { %v1928_v18 = vpop.permute.xlu1 %1927 }
 0x5e9   : > { %v1997_v62 = vmul.f32 %v1928_v18, %v3740_v49  ;;  %v1918_v19 = vpop.permute.xlu0 %1917 }
 0x5ea   : > { %v1995_v42 = vmul.f32 %v1918_v19, %v3743_v8 }
 0x5eb   : > { %2013 = vst [vmem:[%s3068_s19 + $0x10] sm:$0xff] %v1997_v62 }
 0x5ec   : > { %2011 = vst [vmem:[%s3068_s19] sm:$0xff] %v1995_v42  ;;  %v1933_v39 = vpop.permute.xlu1 %1932 }
 0x5ed   : > { %v1998_v22 = vmul.f32 %v1933_v39, %v3746_v24  ;;  %v1923_v23 = vpop.permute.xlu0 %1922 }
 0x5ee   : > { %v1996_v1 = vmul.f32 %v1923_v23, %v3750_v10 }
 0x5ef   : > { %2014 = vst [vmem:[%s3068_s19 + $0x18] sm:$0xff] %v1998_v22 }
 0x5f0   : > { %2012 = vst [vmem:[%s3068_s19 + $0x8] sm:$0xff] %v1996_v1 }
 0x5f3   : > { %v1943_v46 = vpop.permute.xlu1 %1942 }
 0x5f4   : > { %v2000_v63 = vmul.f32 %v1943_v46, %v3756_v41  ;;  %v1938_v25 = vpop.permute.xlu0 %1937 }
 0x5f5   : > { %v1999_v26 = vmul.f32 %v1938_v25, %v3759_v51 }
 0x5f6   : > { %2016 = vst [vmem:[%s3068_s19 + $0x28] sm:$0xff] %v2000_v63 }
 0x5f7   : > { %2015 = vst [vmem:[%s3068_s19 + $0x20] sm:$0xff] %v1999_v26  ;;  %v1953_v43 = vpop.permute.xlu1 %1952 }
 0x5f8   : > { %v2002_v28 = vmul.f32 %v1953_v43, %v3764_v52  ;;  %v1948_v29 = vpop.permute.xlu0 %1947 }
 0x5f9   : > { %v2001_v5 = vmul.f32 %v1948_v29, %v3767_v12 }
 0x5fa   : > { %2018 = vst [vmem:[%s3068_s19 + $0x38] sm:$0xff] %v2002_v28 }
 0x5fb   : > { %2017 = vst [vmem:[%s3068_s19 + $0x30] sm:$0xff] %v2001_v5  ;;  %v1963_v37 = vpop.permute.xlu1 %1962 }
 0x5fc   : > { %v2004_v34 = vmul.f32 %v1963_v37, %v3772_v53  ;;  %v1958_v30 = vpop.permute.xlu0 %1957 }
 0x5fd   : > { %v2003_v48 = vmul.f32 %v1958_v30, %v3775_v38 }
 0x5fe   : > { %2020 = vst [vmem:[%s3068_s19 + $0x48] sm:$0xff] %v2004_v34 }
 0x5ff   : > { %2019 = vst [vmem:[%s3068_s19 + $0x40] sm:$0xff] %v2003_v48  ;;  %v1973_v31 = vpop.permute.xlu1 %1972 }
 0x600   : > { %v2006_v32 = vmul.f32 %v1973_v31, %v3780_v60  ;;  %v1968_v57 = vpop.permute.xlu0 %1967 }
 0x601   : > { %v2005_v33 = vmul.f32 %v1968_v57, %v3783_v0 }
 0x602   : > { %2022 = vst [vmem:[%s3068_s19 + $0x58] sm:$0xff] %v2006_v32 }
 0x603   : > { %2021 = vst [vmem:[%s3068_s19 + $0x50] sm:$0xff] %v2005_v33  ;;  %v1983_v40 = vpop.permute.xlu1 %1982 }
 0x604   : > { %v2008_v3 = vmul.f32 %v1983_v40, %v3788_v4  ;;  %v1978_v58 = vpop.permute.xlu0 %1977 }
 0x605   : > { %v2007_v45 = vmul.f32 %v1978_v58, %v3791_v7 }
 0x606   : > { %2024 = vst [vmem:[%s3068_s19 + $0x68] sm:$0xff] %v2008_v3 }
 0x607   : > { %2023 = vst [vmem:[%s3068_s19 + $0x60] sm:$0xff] %v2007_v45  ;;  %v1993_v35 = vpop.permute.xlu1 %1992 }
 0x608   : > { %v2010_v20 = vmul.f32 %v1993_v35, %v3796_v54  ;;  %v1988_v44 = vpop.permute.xlu0 %1987 }
 0x609   : > { %v2009_v49 = vmul.f32 %v1988_v44, %v3799_v61 }
 0x60a   : > { %2026 = vst [vmem:[%s3068_s19 + $0x78] sm:$0xff] %v2010_v20 }
 0x60b   : > { %2025 = vst [vmem:[%s3068_s19 + $0x70] sm:$0xff] %v2009_v49 }
 0x60c PF: > { %s2261_s24 = sshll.u32 %s2908_s25, 11  ;;  %s2041_s14 = sshll.u32 %s3068_s19, 4  ;;  %s3842_s14 = int_to_ptr.vmem [resolvable:$true] %s2041_s14 }
 0x60d   : > { %s3839_s13 = scalar_lea.hbm %s3904_s6, %s2261_s24  ;;  %s3934_s15 = sand.u32 1, %s2896_s22  }
 0x60e   : > { %s3846_s16 = scalar_lea.sflag [#allocation4], %s3934_s15  ;;  %s2826_s17 = scalar_lea.vmem %s3842_s14, 2048 }
 0x60f   : > { %p2827_p4 = scmp.ne.s32.totalorder %s3842_s14, %s2826_s17  ;;  %s2930_s25 = smov [#allocation3]  }
 0x610   : > { %s2830_s20 = sshll.u32 %s2930_s25, 4  ;;  %s2831_s20 = int_to_ptr.vmem [resolvable:$false] %s2830_s20 }
 0x611   : > { %p2828_p5 = pnand %p2827_p4, %p3017_p3  ;;  %s2832_s29 = scalar_lea.vmem %s2831_s20, 4096 }
 0x612   : > { %p2833_p7 = scmp.lt.s32.totalorder %s3842_s14, %s2831_s20  ;;  %p2834_p8 = scmp.lt.s32.totalorder %s2832_s29, %s2826_s17 }
 0x613   : > { %p2829_p6 = pneg %p2828_p5 }
 0x614   : > { %p2835_p10 = por %p2834_p8, %p2833_p7 }
 0x616   : > { %p2836_p11 = pnand %p2835_p10, %p2829_p6 }
 0x618   : > { %2839 = shalt.err (!%p2836_p11)
}
 0x619   : > { %s2840_s19 = scalar_lea.hbm %s3839_s13, 2048  ;;  %s2844_s12 = scalar_lea.hbm %s3904_s6, 4096 }
 0x61a   : > { %p2841_p12 = scmp.ne.s32.totalorder %s3839_s13, %s2840_s19  ;;  %p2845_p1 = scmp.lt.u32.totalorder %s3839_s13, %s3904_s6 }
 0x61b   : > { %p2846_p2 = scmp.lt.u32.totalorder %s2844_s12, %s2840_s19  ;;  %p2848_p5 = scmp.lt.u32.totalorder %s2840_s19, %s3839_s13 }
 0x61c   : > { %p2842_p13 = pnand %p2841_p12, %p3017_p3 }
 0x61d   : > { %p2847_p4 = por %p2846_p2, %p2845_p1 }
 0x61e   : > { %p2843_p0 = pneg %p2842_p13 }
 0x61f   : > { %p2849_p6 = por %p2848_p5, %p2847_p4 }
 0x621   : > { %p2850_p7 = pnand %p2849_p6, %p2843_p0 }
 0x623   : > { %2853 = shalt.err (!%p2850_p7)
}
 0x624   : > { %s2931_s27 = smov 128   ;;  %s2932_s8 = smov 8  }
 0x625   : > { %2614 = dma.vmem_to_hbm [thread:$0]  (%p3017_p3), %s3842_s14, 2048, %s3839_s13, %s3846_s16, %s2931_s27, %s2931_s27, %s2932_s8  }
 0x626 PF: > { %p2620_p8 = scmp.ge.s32.totalorder %s2920_s28, 2  ;;  %s2056_s24 = sand.u32 1, %s2892_s21  }
 0x627   : > { %s2057_s26 = scalar_lea.sflag [#allocation4], %s2056_s24 }
 0x628   : > { %p2617_p10 = pnand %p2620_p8, %p3027_p9 }
 0x62a   : > { %2887 = dma.done.wait (!%p2617_p10), %s2057_s26, 2048  }
 0x62b   : > { %2889 = vsyncadd (!%p2617_p10), %s2057_s26, 4294965248  ;;  %s19_s28 = sadd.s32 1, %s2920_s28   ;;  %s3935_s18 = sld [smem:[#allocation6_spill]] }
 0x62c   : > { %p16_p11 = scmp.ge.s32.totalorder %s19_s28, 6   ;;  %s3936_s23 = sld [smem:[#allocation11_spill]] }
 0x62d   : > { %s3937_s24 = sld [smem:[#allocation7_spill]]  ;;  %s3938_s25 = sld [smem:[#allocation8_spill]] }
 0x62e   : > { %s3939_s26 = sld [smem:[#allocation9_spill]]  ;;  %s3940_s27 = sld [smem:[#allocation10_spill]] }
 0x62f   : > { %s3941_s21 = smov %s2896_s22  ;;  %18 = sbr.rel (!%p16_p11) target bundleno = 5 (0x5), region = 96 }
 0x631   : > { %s3942_s22 = smov %s3935_s18 }
 0x636   :  { %2062 = vsyncpa [#allocation4], 1 }
 0x637   :  { %2064 = vsyncpa [#allocation4 + $0x1], 1 }

</bundles_post_ra>
